<compile_context>
chip_gen: v7x
topology: tpu7x:2x2x1
jax: 0.10.0
libtpu: 0.0.40
codegen_flags: <defaults>
</compile_context>

<pallas_src>
import functools

import jax
import jax.numpy as jnp
import numpy as np
from jax import lax
from jax.experimental import pallas as pl
from jax.experimental.pallas import tpu as pltpu


_VMEM_LIMIT = 32 * 1024 * 1024  # explicit scoped-VMEM budget; safe on v5e/v6e/v7x


def _pick_batch_block(batch, cap, align=1):
    """Largest divisor of `batch` that is <= cap (and a multiple of align)."""
    if batch <= cap:
        return batch
    for cand in range(cap, 0, -1):
        if batch % cand == 0 and cand % align == 0:
            return cand
    return batch


# ----------------------------------------------------------------------------
# Kernel 1/2: convolution as accumulated shifted matmuls over a flattened,
# space-to-depth'd input.  Bias + ReLU fused.  4 taps, each a contiguous
# VMEM slice -> (L, Cin) @ (Cin, Cout) on the MXU with f32 accumulation.
# ----------------------------------------------------------------------------
def _conv_taps_kernel(x_ref, w_ref, b_ref, o_ref, *, tap_offsets):
    # x_ref: (BB, Lin, Cin)   bf16   flattened space-to-depth input (+ zero pad rows)
    # w_ref: (T,  Cin, Cout)  bf16   one (Cin, Cout) matrix per kernel tap
    # b_ref: (1,  Cout)       f32
    # o_ref: (BB, Lout, Cout) bf16   flattened output (some rows are don't-care)
    bb, l_out, c_out = o_ref.shape
    bias = b_ref[...]                                   # (1, Cout) f32
    for b in range(bb):                                 # BB is small (<= 8), unrolled
        acc = jnp.zeros((l_out, c_out), jnp.float32)
        for t, r0 in enumerate(tap_offsets):            # 4 taps, contiguous slices
            acc += jnp.dot(x_ref[b, pl.ds(r0, l_out), :], w_ref[t],
                           preferred_element_type=jnp.float32)
        o_ref[b] = jnp.maximum(acc + bias, 0.0).astype(o_ref.dtype)


def _conv_layer(xflat, w_taps, bias, tap_offsets, l_out, block_b):
    B, Lin, Cin = xflat.shape
    T, _, Cout = w_taps.shape
    grid = (B // block_b,)
    cost = pl.CostEstimate(
        flops=2 * B * l_out * Cin * Cout * T,
        transcendentals=0,
        bytes_accessed=(B * Lin * Cin * 2 + T * Cin * Cout * 2
                        + Cout * 4 + B * l_out * Cout * 2),
    )
    return pl.pallas_call(
        functools.partial(_conv_taps_kernel, tap_offsets=tuple(tap_offsets)),
        out_shape=jax.ShapeDtypeStruct((B, l_out, Cout), jnp.bfloat16),
        grid=grid,
        in_specs=[
            pl.BlockSpec((block_b, Lin, Cin), lambda i: (i, 0, 0)),
            pl.BlockSpec((T, Cin, Cout), lambda i: (0, 0, 0)),
            pl.BlockSpec((1, Cout), lambda i: (0, 0)),
        ],
        out_specs=pl.BlockSpec((block_b, l_out, Cout), lambda i: (i, 0, 0)),
        compiler_params=pltpu.CompilerParams(
            dimension_semantics=("parallel",),       # megacore sharding on v7x
            vmem_limit_bytes=_VMEM_LIMIT),
        cost_estimate=cost,
    )(xflat, w_taps, bias)


# ----------------------------------------------------------------------------
# Kernel 3: fused fc1(+ReLU) + fc2.  The (TB, 256) hidden never hits HBM.
# Output N is padded to 128 lanes (lane-dense store); sliced in the wrapper.
# ----------------------------------------------------------------------------
def _fc_head_kernel(x_ref, w3_ref, b3_ref, w4_ref, b4_ref, o_ref):
    h = jnp.dot(x_ref[...], w3_ref[...], preferred_element_type=jnp.float32)
    h = jnp.maximum(h + b3_ref[...], 0.0).astype(jnp.bfloat16)
    o_ref[...] = jnp.dot(h, w4_ref[...],
                         preferred_element_type=jnp.float32) + b4_ref[...]


def _fc_head(flat, w3, b3, w4, b4, block_m):
    B, Kp = flat.shape
    N1 = w3.shape[1]
    Np = w4.shape[1]
    grid = (B // block_m,)
    cost = pl.CostEstimate(
        flops=2 * B * (Kp * N1 + N1 * Np),
        transcendentals=0,
        bytes_accessed=(B * Kp * 2 + Kp * N1 * 2 + N1 * Np * 2
                        + (N1 + Np) * 4 + B * Np * 4),
    )
    return pl.pallas_call(
        _fc_head_kernel,
        out_shape=jax.ShapeDtypeStruct((B, Np), jnp.float32),
        grid=grid,
        in_specs=[
            pl.BlockSpec((block_m, Kp), lambda i: (i, 0)),
            pl.BlockSpec((Kp, N1), lambda i: (0, 0)),
            pl.BlockSpec((1, N1), lambda i: (0, 0)),
            pl.BlockSpec((N1, Np), lambda i: (0, 0)),
            pl.BlockSpec((1, Np), lambda i: (0, 0)),
        ],
        out_specs=pl.BlockSpec((block_m, Np), lambda i: (i, 0)),
        compiler_params=pltpu.CompilerParams(
            dimension_semantics=("parallel",),
            vmem_limit_bytes=_VMEM_LIMIT),
        cost_estimate=cost,
    )(flat, w3, b3, w4, b4)


# ----------------------------------------------------------------------------
# Parameter construction (shapes from ConvModel.__init__).
#   conv1 (4->16, 8x8, s4)  stored as 2x2 taps over space-to-depth(4) input,
#                           channel order (r, c, ch) -> 64;   1/255 folded in.
#   conv2 (16->32, 4x4, s2) stored as 2x2 taps over space-to-depth(2) of h1.
#   fc1   (fc_size->256)    stored with the PyTorch NCHW-flatten permutation
#                           and the padded conv2-output layout folded in (w3p).
#   fc2   (256->A)          padded to 128 output lanes (w4p/b4p).
# ----------------------------------------------------------------------------
def init_params(obs_shape, num_actions, key):
    C_in, H, W = obs_shape
    assert C_in == 4 and H % 4 == 0 and W % 4 == 0
    H4, W4 = H // 4, W // 4
    oh1, ow1 = H4 - 1, W4 - 1                 # conv1 output spatial
    oh2, ow2 = (oh1 - 4) // 2 + 1, (ow1 - 4) // 2 + 1
    assert oh2 >= 1 and ow2 >= 1
    H2s, W2s = oh2 + 1, ow2 + 1               # space-to-depth(2) grid for conv2
    L1 = oh1 * W4                             # flattened conv1 output rows (padded width)
    L2 = oh2 * W2s                            # flattened conv2 output rows (padded width)
    L2p = -(-L2 // 4) * 4                     # pad rows so Kp = L2p*32 is a mult of 128
    Kp = L2p * 32
    fc_size = 32 * oh2 * ow2
    Np = max(128, -(-num_actions // 128) * 128)

    k = jax.random.split(key, 8)

    def ws(fan_in):
        return 1.0 / jnp.sqrt(jnp.float32(fan_in))

    # conv1 taps [di, dj, (r,c,ch)=64, 16]; 1/255 input scale folded into the weights
    w1 = jax.random.normal(k[0], (2, 2, 64, 16), jnp.float32) * ws(8 * 8 * 4) / 255.0
    b1 = jax.random.normal(k[1], (1, 16), jnp.float32) * 0.01
    # conv2 taps [di, dj, (r,c,ch)=64, 32]
    w2 = jax.random.normal(k[2], (2, 2, 64, 32), jnp.float32) * ws(4 * 4 * 16)
    b2 = jax.random.normal(k[3], (1, 32), jnp.float32) * 0.01

    # fc1 in PyTorch NCHW-flatten order, then fold permutation + layout padding.
    w3_nat = jax.random.normal(k[4], (fc_size, 256), jnp.float32) * ws(fc_size)
    b3 = jax.random.normal(k[5], (1, 256), jnp.float32) * 0.01
    p = jnp.arange(L2p)
    oi2, oj2 = p // W2s, p % W2s
    valid = (p < L2) & (oj2 < ow2)            # garbage column / pad rows get zero weights
    co = jnp.arange(32)
    nat_idx = co[None, :] * (oh2 * ow2) + oi2[:, None] * ow2 + oj2[:, None]
    rows = jnp.where(valid[:, None, None],
                     w3_nat[jnp.clip(nat_idx, 0, fc_size - 1)], 0.0)   # (L2p, 32, 256)
    w3p = rows.reshape(Kp, 256)

    w4 = jax.random.normal(k[6], (256, num_actions), jnp.float32) * ws(256)
    b4 = jax.random.normal(k[7], (1, num_actions), jnp.float32) * 0.01
    w4p = jnp.zeros((256, Np), jnp.float32).at[:, :num_actions].set(w4)
    b4p = jnp.zeros((1, Np), jnp.float32).at[:, :num_actions].set(b4)

    params = dict(
        w1t=w1.reshape(4, 64, 16).astype(jnp.bfloat16), b1=b1,
        w2t=w2.reshape(4, 64, 32).astype(jnp.bfloat16), b2=b2,
        w3p=w3p.astype(jnp.bfloat16), b3=b3,
        w4p=w4p.astype(jnp.bfloat16), b4p=b4p,
        # bf16-rounded f32 copies used ONLY by the pure-JAX reference check:
        ref_w3=w3_nat.astype(jnp.bfloat16).astype(jnp.float32),
        ref_w4=w4.astype(jnp.bfloat16).astype(jnp.float32),
        ref_b4=b4,
    )
    dims = dict(H=H, W=W, H4=H4, W4=W4, oh1=oh1, ow1=ow1, oh2=oh2, ow2=ow2,
                H2s=H2s, W2s=W2s, L1=L1, L2=L2, L2p=L2p, Kp=Kp, Np=Np,
                num_actions=num_actions)
    return params, dims


# ----------------------------------------------------------------------------
# Forward pass (matches ConvModel.forward).  Wrapper ops are pure relayouts
# (transpose / reshape / pad) of tiny tensors; all FLOPs run in Pallas.
# ----------------------------------------------------------------------------
def conv_model_forward(x_nchw, params, dims):
    d = dims
    B = x_nchw.shape[0]
    H4, W4, H2s, W2s = d["H4"], d["W4"], d["H2s"], d["W2s"]

    bb = _pick_batch_block(B, 8)              # conv kernels: samples per grid step
    tm = _pick_batch_block(B, 256, align=8)   # fc kernel: rows per grid step

    # --- input relayout: NCHW -> NHWC -> space-to-depth(4) -> flatten (no expansion) ---
    x = jnp.transpose(x_nchw, (0, 2, 3, 1))                               # (B,H,W,4)
    x = x.reshape(B, H4, 4, W4, 4, 4).transpose(0, 1, 3, 2, 4, 5)
    x = x.reshape(B, H4, W4, 64).astype(jnp.bfloat16)
    x = jnp.pad(x, ((0, 0), (0, 1), (0, 0), (0, 0)))                      # 1 zero row-block
    xflat = x.reshape(B, (H4 + 1) * W4, 64)

    # conv1 + ReLU (1/255 already folded into w1)
    taps1 = tuple(di * W4 + dj for di in range(2) for dj in range(2))
    h1 = _conv_layer(xflat, params["w1t"], params["b1"], taps1, d["L1"], bb)

    # relayout for conv2: drop garbage column(s), space-to-depth(2), flatten
    h1 = h1.reshape(B, d["oh1"], W4, 16)[:, :2 * H2s, :2 * W2s, :]
    h1 = h1.reshape(B, H2s, 2, W2s, 2, 16).transpose(0, 1, 3, 2, 4, 5)
    h1 = h1.reshape(B, H2s, W2s, 64)
    h1 = jnp.pad(h1, ((0, 0), (0, 2), (0, 0), (0, 0)))                    # 2 zero row-blocks
    h1f = h1.reshape(B, (H2s + 2) * W2s, 64)

    # conv2 + ReLU
    taps2 = tuple(di * W2s + dj for di in range(2) for dj in range(2))
    h2 = _conv_layer(h1f, params["w2t"], params["b2"], taps2, d["L2p"], bb)

    # fused fc1+ReLU+fc2 (NCHW-flatten permutation folded into w3p, output lane-padded)
    flat = h2.reshape(B, d["Kp"])
    out = _fc_head(flat, params["w3p"], params["b3"], params["w4p"], params["b4p"], tm)
    return out[:, :d["num_actions"]]


# ----------------------------------------------------------------------------
# Pure-JAX f32 reference (sliding-window convs + PyTorch NCHW flatten) used
# only for the correctness check in __main__.
# ----------------------------------------------------------------------------
def reference_forward(x_nchw, params, dims):
    B = x_nchw.shape[0]
    f32 = jnp.float32
    w1 = params["w1t"].astype(f32).reshape(2, 2, 4, 4, 4, 16)             # di,dj,r,c,ci,co
    wd1 = w1.transpose(0, 2, 1, 3, 4, 5).reshape(8, 8, 4, 16)             # kh,kw,ci,co
    w2 = params["w2t"].astype(f32).reshape(2, 2, 2, 2, 16, 32)
    wd2 = w2.transpose(0, 2, 1, 3, 4, 5).reshape(4, 4, 16, 32)
    x = jnp.transpose(x_nchw, (0, 2, 3, 1)).astype(f32)                   # 1/255 is in wd1
    dn = ("NHWC", "HWIO", "NHWC")
    h1 = lax.conv_general_dilated(x, wd1, (4, 4), "VALID", dimension_numbers=dn)
    h1 = jnp.maximum(h1 + params["b1"].reshape(1, 1, 1, -1), 0.0)
    h2 = lax.conv_general_dilated(h1, wd2, (2, 2), "VALID", dimension_numbers=dn)
    h2 = jnp.maximum(h2 + params["b2"].reshape(1, 1, 1, -1), 0.0)
    flat = jnp.transpose(h2, (0, 3, 1, 2)).reshape(B, -1)                 # NCHW flatten
    h3 = jnp.maximum(flat @ params["ref_w3"] + params["b3"], 0.0)
    return h3 @ params["ref_w4"] + params["ref_b4"]


if __name__ == "__main__":
    obs_shape = (4, 32, 32)     # (C, H, W), small Atari-like stack of 4 frames
    num_actions = 6
    batch = 2

    key = jax.random.PRNGKey(0)
    pkey, xkey = jax.random.split(key)
    params, dims = init_params(obs_shape, num_actions, pkey)

    # uint8-range pixel input, like Atari frames, NCHW (PyTorch layout)
    x = jax.random.randint(xkey, (batch, *obs_shape), 0, 256).astype(jnp.float32)

    fwd = jax.jit(functools.partial(conv_model_forward, dims=dims))
    out = fwd(x, params)
    jax.block_until_ready(out)
    assert out.shape == (batch, num_actions)

    ref = reference_forward(x, params, dims)
    np.testing.assert_allclose(np.asarray(out), np.asarray(ref), rtol=5e-2, atol=3e-2)
    print("KERNEL_OK")
</pallas_src>

<mosaic_0001>
module attributes {stable_mosaic.version = 11 : i64} {
  func.func @_conv_taps_kernel(%arg0: i32, %arg1: memref<2x72x64xbf16, #tpu.memory_space<vmem>>, %arg2: memref<4x64x16xbf16, #tpu.memory_space<vmem>>, %arg3: memref<1x16xf32, #tpu.memory_space<vmem>>, %arg4: memref<2x56x16xbf16, #tpu.memory_space<vmem>>) attributes {dimension_semantics = [#tpu.dimension_semantics<parallel>], iteration_bounds = array<i64: 1>, scalar_prefetch = 0 : i64, scratch_operands = 0 : i64, tpu.core_type = #tpu.core_type<tc>, window_params = [{transform_indices = @transform_0, window_bounds = array<i64: 2, 72, 64>}, {pipeline_mode = #tpu.pipeline_mode<synchronous>, transform_indices = @transform_1, window_bounds = array<i64: 4, 64, 16>}, {pipeline_mode = #tpu.pipeline_mode<synchronous>, transform_indices = @transform_2, window_bounds = array<i64: 1, 16>}, {transform_indices = @transform_3, window_bounds = array<i64: 2, 56, 16>}]} {
    %c0 = arith.constant 0 : index
    %c0_0 = arith.constant 0 : index
    %0 = vector.load %arg3[%c0, %c0_0] : memref<1x16xf32, #tpu.memory_space<vmem>>, vector<1x16xf32>
    %cst = arith.constant 0.000000e+00 : f32
    %1 = vector.broadcast %cst : f32 to vector<56x16xf32>
    %c0_1 = arith.constant 0 : index
    %c0_2 = arith.constant 0 : index
    %c0_3 = arith.constant 0 : index
    %2 = vector.load %arg1[%c0_1, %c0_2, %c0_3] : memref<2x72x64xbf16, #tpu.memory_space<vmem>>, vector<1x56x64xbf16>
    %3 = vector.shape_cast %2 : vector<1x56x64xbf16> to vector<56x64xbf16>
    %c0_4 = arith.constant 0 : index
    %c0_5 = arith.constant 0 : index
    %c0_6 = arith.constant 0 : index
    %4 = vector.load %arg2[%c0_4, %c0_5, %c0_6] : memref<4x64x16xbf16, #tpu.memory_space<vmem>>, vector<1x64x16xbf16>
    %5 = vector.shape_cast %4 : vector<1x64x16xbf16> to vector<64x16xbf16>
    %cst_7 = arith.constant dense<0.000000e+00> : vector<56x16xf32>
    %6 = tpu.matmul %3, %5, %cst_7 {dimension_numbers = #tpu.dot_dimension_numbers<[1], [0], [0], [1], [0, 0, 1, 1], [], []>} : vector<56x64xbf16>, vector<64x16xbf16>, vector<56x16xf32> -> vector<56x16xf32>
    %7 = arith.addf %1, %6 : vector<56x16xf32>
    %c0_8 = arith.constant 0 : index
    %c1 = arith.constant 1 : index
    %c0_9 = arith.constant 0 : index
    %8 = vector.load %arg1[%c0_8, %c1, %c0_9] : memref<2x72x64xbf16, #tpu.memory_space<vmem>>, vector<1x56x64xbf16>
    %9 = vector.shape_cast %8 : vector<1x56x64xbf16> to vector<56x64xbf16>
    %c1_10 = arith.constant 1 : index
    %c0_11 = arith.constant 0 : index
    %c0_12 = arith.constant 0 : index
    %10 = vector.load %arg2[%c1_10, %c0_11, %c0_12] : memref<4x64x16xbf16, #tpu.memory_space<vmem>>, vector<1x64x16xbf16>
    %11 = vector.shape_cast %10 : vector<1x64x16xbf16> to vector<64x16xbf16>
    %cst_13 = arith.constant dense<0.000000e+00> : vector<56x16xf32>
    %12 = tpu.matmul %9, %11, %cst_13 {dimension_numbers = #tpu.dot_dimension_numbers<[1], [0], [0], [1], [0, 0, 1, 1], [], []>} : vector<56x64xbf16>, vector<64x16xbf16>, vector<56x16xf32> -> vector<56x16xf32>
    %13 = arith.addf %7, %12 : vector<56x16xf32>
    %c0_14 = arith.constant 0 : index
    %c8 = arith.constant 8 : index
    %c0_15 = arith.constant 0 : index
    %14 = vector.load %arg1[%c0_14, %c8, %c0_15] : memref<2x72x64xbf16, #tpu.memory_space<vmem>>, vector<1x56x64xbf16>
    %15 = vector.shape_cast %14 : vector<1x56x64xbf16> to vector<56x64xbf16>
    %c2 = arith.constant 2 : index
    %c0_16 = arith.constant 0 : index
    %c0_17 = arith.constant 0 : index
    %16 = vector.load %arg2[%c2, %c0_16, %c0_17] : memref<4x64x16xbf16, #tpu.memory_space<vmem>>, vector<1x64x16xbf16>
    %17 = vector.shape_cast %16 : vector<1x64x16xbf16> to vector<64x16xbf16>
    %cst_18 = arith.constant dense<0.000000e+00> : vector<56x16xf32>
    %18 = tpu.matmul %15, %17, %cst_18 {dimension_numbers = #tpu.dot_dimension_numbers<[1], [0], [0], [1], [0, 0, 1, 1], [], []>} : vector<56x64xbf16>, vector<64x16xbf16>, vector<56x16xf32> -> vector<56x16xf32>
    %19 = arith.addf %13, %18 : vector<56x16xf32>
    %c0_19 = arith.constant 0 : index
    %c9 = arith.constant 9 : index
    %c0_20 = arith.constant 0 : index
    %20 = vector.load %arg1[%c0_19, %c9, %c0_20] : memref<2x72x64xbf16, #tpu.memory_space<vmem>>, vector<1x56x64xbf16>
    %21 = vector.shape_cast %20 : vector<1x56x64xbf16> to vector<56x64xbf16>
    %c3 = arith.constant 3 : index
    %c0_21 = arith.constant 0 : index
    %c0_22 = arith.constant 0 : index
    %22 = vector.load %arg2[%c3, %c0_21, %c0_22] : memref<4x64x16xbf16, #tpu.memory_space<vmem>>, vector<1x64x16xbf16>
    %23 = vector.shape_cast %22 : vector<1x64x16xbf16> to vector<64x16xbf16>
    %cst_23 = arith.constant dense<0.000000e+00> : vector<56x16xf32>
    %24 = tpu.matmul %21, %23, %cst_23 {dimension_numbers = #tpu.dot_dimension_numbers<[1], [0], [0], [1], [0, 0, 1, 1], [], []>} : vector<56x64xbf16>, vector<64x16xbf16>, vector<56x16xf32> -> vector<56x16xf32>
    %25 = arith.addf %19, %24 : vector<56x16xf32>
    %26 = vector.broadcast %0 : vector<1x16xf32> to vector<56x16xf32>
    %27 = arith.addf %25, %26 : vector<56x16xf32>
    %cst_24 = arith.constant 0.000000e+00 : f32
    %28 = vector.broadcast %cst_24 : f32 to vector<56x16xf32>
    %29 = arith.maximumf %27, %28 : vector<56x16xf32>
    %30 = arith.truncf %29 : vector<56x16xf32> to vector<56x16xbf16>
    %c0_25 = arith.constant 0 : index
    %c0_26 = arith.constant 0 : index
    %c0_27 = arith.constant 0 : index
    %31 = vector.load %arg4[%c0_25, %c0_26, %c0_27] : memref<2x56x16xbf16, #tpu.memory_space<vmem>>, vector<1x56x16xbf16>
    %32 = vector.shape_cast %31 : vector<1x56x16xbf16> to vector<56x16xbf16>
    %33 = vector.shape_cast %30 : vector<56x16xbf16> to vector<1x56x16xbf16>
    tpu.vector_store %arg4[%c0_25, %c0_26, %c0_27], %33 {strides = array<i32>} : memref<2x56x16xbf16, #tpu.memory_space<vmem>>, vector<1x56x16xbf16>,
    %cst_28 = arith.constant 0.000000e+00 : f32
    %34 = vector.broadcast %cst_28 : f32 to vector<56x16xf32>
    %c1_29 = arith.constant 1 : index
    %c0_30 = arith.constant 0 : index
    %c0_31 = arith.constant 0 : index
    %35 = vector.load %arg1[%c1_29, %c0_30, %c0_31] : memref<2x72x64xbf16, #tpu.memory_space<vmem>>, vector<1x56x64xbf16>
    %36 = vector.shape_cast %35 : vector<1x56x64xbf16> to vector<56x64xbf16>
    %c0_32 = arith.constant 0 : index
    %c0_33 = arith.constant 0 : index
    %c0_34 = arith.constant 0 : index
    %37 = vector.load %arg2[%c0_32, %c0_33, %c0_34] : memref<4x64x16xbf16, #tpu.memory_space<vmem>>, vector<1x64x16xbf16>
    %38 = vector.shape_cast %37 : vector<1x64x16xbf16> to vector<64x16xbf16>
    %cst_35 = arith.constant dense<0.000000e+00> : vector<56x16xf32>
    %39 = tpu.matmul %36, %38, %cst_35 {dimension_numbers = #tpu.dot_dimension_numbers<[1], [0], [0], [1], [0, 0, 1, 1], [], []>} : vector<56x64xbf16>, vector<64x16xbf16>, vector<56x16xf32> -> vector<56x16xf32>
    %40 = arith.addf %34, %39 : vector<56x16xf32>
    %c1_36 = arith.constant 1 : index
    %c1_37 = arith.constant 1 : index
    %c0_38 = arith.constant 0 : index
    %41 = vector.load %arg1[%c1_36, %c1_37, %c0_38] : memref<2x72x64xbf16, #tpu.memory_space<vmem>>, vector<1x56x64xbf16>
    %42 = vector.shape_cast %41 : vector<1x56x64xbf16> to vector<56x64xbf16>
    %c1_39 = arith.constant 1 : index
    %c0_40 = arith.constant 0 : index
    %c0_41 = arith.constant 0 : index
    %43 = vector.load %arg2[%c1_39, %c0_40, %c0_41] : memref<4x64x16xbf16, #tpu.memory_space<vmem>>, vector<1x64x16xbf16>
    %44 = vector.shape_cast %43 : vector<1x64x16xbf16> to vector<64x16xbf16>
    %cst_42 = arith.constant dense<0.000000e+00> : vector<56x16xf32>
    %45 = tpu.matmul %42, %44, %cst_42 {dimension_numbers = #tpu.dot_dimension_numbers<[1], [0], [0], [1], [0, 0, 1, 1], [], []>} : vector<56x64xbf16>, vector<64x16xbf16>, vector<56x16xf32> -> vector<56x16xf32>
    %46 = arith.addf %40, %45 : vector<56x16xf32>
    %c1_43 = arith.constant 1 : index
    %c8_44 = arith.constant 8 : index
    %c0_45 = arith.constant 0 : index
    %47 = vector.load %arg1[%c1_43, %c8_44, %c0_45] : memref<2x72x64xbf16, #tpu.memory_space<vmem>>, vector<1x56x64xbf16>
    %48 = vector.shape_cast %47 : vector<1x56x64xbf16> to vector<56x64xbf16>
    %c2_46 = arith.constant 2 : index
    %c0_47 = arith.constant 0 : index
    %c0_48 = arith.constant 0 : index
    %49 = vector.load %arg2[%c2_46, %c0_47, %c0_48] : memref<4x64x16xbf16, #tpu.memory_space<vmem>>, vector<1x64x16xbf16>
    %50 = vector.shape_cast %49 : vector<1x64x16xbf16> to vector<64x16xbf16>
    %cst_49 = arith.constant dense<0.000000e+00> : vector<56x16xf32>
    %51 = tpu.matmul %48, %50, %cst_49 {dimension_numbers = #tpu.dot_dimension_numbers<[1], [0], [0], [1], [0, 0, 1, 1], [], []>} : vector<56x64xbf16>, vector<64x16xbf16>, vector<56x16xf32> -> vector<56x16xf32>
    %52 = arith.addf %46, %51 : vector<56x16xf32>
    %c1_50 = arith.constant 1 : index
    %c9_51 = arith.constant 9 : index
    %c0_52 = arith.constant 0 : index
    %53 = vector.load %arg1[%c1_50, %c9_51, %c0_52] : memref<2x72x64xbf16, #tpu.memory_space<vmem>>, vector<1x56x64xbf16>
    %54 = vector.shape_cast %53 : vector<1x56x64xbf16> to vector<56x64xbf16>
    %c3_53 = arith.constant 3 : index
    %c0_54 = arith.constant 0 : index
    %c0_55 = arith.constant 0 : index
    %55 = vector.load %arg2[%c3_53, %c0_54, %c0_55] : memref<4x64x16xbf16, #tpu.memory_space<vmem>>, vector<1x64x16xbf16>
    %56 = vector.shape_cast %55 : vector<1x64x16xbf16> to vector<64x16xbf16>
    %cst_56 = arith.constant dense<0.000000e+00> : vector<56x16xf32>
    %57 = tpu.matmul %54, %56, %cst_56 {dimension_numbers = #tpu.dot_dimension_numbers<[1], [0], [0], [1], [0, 0, 1, 1], [], []>} : vector<56x64xbf16>, vector<64x16xbf16>, vector<56x16xf32> -> vector<56x16xf32>
    %58 = arith.addf %52, %57 : vector<56x16xf32>
    %59 = vector.broadcast %0 : vector<1x16xf32> to vector<56x16xf32>
    %60 = arith.addf %58, %59 : vector<56x16xf32>
    %cst_57 = arith.constant 0.000000e+00 : f32
    %61 = vector.broadcast %cst_57 : f32 to vector<56x16xf32>
    %62 = arith.maximumf %60, %61 : vector<56x16xf32>
    %63 = arith.truncf %62 : vector<56x16xf32> to vector<56x16xbf16>
    %c1_58 = arith.constant 1 : index
    %c0_59 = arith.constant 0 : index
    %c0_60 = arith.constant 0 : index
    %64 = vector.load %arg4[%c1_58, %c0_59, %c0_60] : memref<2x56x16xbf16, #tpu.memory_space<vmem>>, vector<1x56x16xbf16>
    %65 = vector.shape_cast %64 : vector<1x56x16xbf16> to vector<56x16xbf16>
    %66 = vector.shape_cast %63 : vector<56x16xbf16> to vector<1x56x16xbf16>
    tpu.vector_store %arg4[%c1_58, %c0_59, %c0_60], %66 {strides = array<i32>} : memref<2x56x16xbf16, #tpu.memory_space<vmem>>, vector<1x56x16xbf16>,
    return
  }
  func.func @transform_0(%arg0: i32) -> (i32, i32, i32) {
    %c0_i32 = arith.constant 0 : i32
    %c0_i32_0 = arith.constant 0 : i32
    %c0_i32_1 = arith.constant 0 : i32
    return %arg0, %c0_i32, %c0_i32_0 : i32, i32, i32
  }
  func.func @transform_1(%arg0: i32) -> (i32, i32, i32) {
    %c0_i32 = arith.constant 0 : i32
    %c0_i32_0 = arith.constant 0 : i32
    %c0_i32_1 = arith.constant 0 : i32
    %c0_i32_2 = arith.constant 0 : i32
    return %c0_i32, %c0_i32_0, %c0_i32_1 : i32, i32, i32
  }
  func.func @transform_2(%arg0: i32) -> (i32, i32) {
    %c0_i32 = arith.constant 0 : i32
    %c0_i32_0 = arith.constant 0 : i32
    %c0_i32_1 = arith.constant 0 : i32
    return %c0_i32, %c0_i32_0 : i32, i32
  }
  func.func @transform_3(%arg0: i32) -> (i32, i32, i32) {
    %c0_i32 = arith.constant 0 : i32
    %c0_i32_0 = arith.constant 0 : i32
    %c0_i32_1 = arith.constant 0 : i32
    return %arg0, %c0_i32, %c0_i32_0 : i32, i32, i32
  }
}

module attributes {stable_mosaic.version = 11 : i64} {
  func.func @_conv_taps_kernel(%arg0: i32, %arg1: memref<2x15x64xbf16, #tpu.memory_space<vmem>>, %arg2: memref<4x64x32xbf16, #tpu.memory_space<vmem>>, %arg3: memref<1x32xf32, #tpu.memory_space<vmem>>, %arg4: memref<2x8x32xbf16, #tpu.memory_space<vmem>>) attributes {dimension_semantics = [#tpu.dimension_semantics<parallel>], iteration_bounds = array<i64: 1>, scalar_prefetch = 0 : i64, scratch_operands = 0 : i64, tpu.core_type = #tpu.core_type<tc>, window_params = [{transform_indices = @transform_0, window_bounds = array<i64: 2, 15, 64>}, {pipeline_mode = #tpu.pipeline_mode<synchronous>, transform_indices = @transform_1, window_bounds = array<i64: 4, 64, 32>}, {pipeline_mode = #tpu.pipeline_mode<synchronous>, transform_indices = @transform_2, window_bounds = array<i64: 1, 32>}, {transform_indices = @transform_3, window_bounds = array<i64: 2, 8, 32>}]} {
    %c0 = arith.constant 0 : index
    %c0_0 = arith.constant 0 : index
    %0 = vector.load %arg3[%c0, %c0_0] : memref<1x32xf32, #tpu.memory_space<vmem>>, vector<1x32xf32>
    %cst = arith.constant 0.000000e+00 : f32
    %1 = vector.broadcast %cst : f32 to vector<8x32xf32>
    %c0_1 = arith.constant 0 : index
    %c0_2 = arith.constant 0 : index
    %c0_3 = arith.constant 0 : index
    %2 = vector.load %arg1[%c0_1, %c0_2, %c0_3] : memref<2x15x64xbf16, #tpu.memory_space<vmem>>, vector<1x8x64xbf16>
    %3 = vector.shape_cast %2 : vector<1x8x64xbf16> to vector<8x64xbf16>
    %c0_4 = arith.constant 0 : index
    %c0_5 = arith.constant 0 : index
    %c0_6 = arith.constant 0 : index
    %4 = vector.load %arg2[%c0_4, %c0_5, %c0_6] : memref<4x64x32xbf16, #tpu.memory_space<vmem>>, vector<1x64x32xbf16>
    %5 = vector.shape_cast %4 : vector<1x64x32xbf16> to vector<64x32xbf16>
    %cst_7 = arith.constant dense<0.000000e+00> : vector<8x32xf32>
    %6 = tpu.matmul %3, %5, %cst_7 {dimension_numbers = #tpu.dot_dimension_numbers<[1], [0], [0], [1], [0, 0, 1, 1], [], []>} : vector<8x64xbf16>, vector<64x32xbf16>, vector<8x32xf32> -> vector<8x32xf32>
    %7 = arith.addf %1, %6 : vector<8x32xf32>
    %c0_8 = arith.constant 0 : index
    %c1 = arith.constant 1 : index
    %c0_9 = arith.constant 0 : index
    %8 = vector.load %arg1[%c0_8, %c1, %c0_9] : memref<2x15x64xbf16, #tpu.memory_space<vmem>>, vector<1x8x64xbf16>
    %9 = vector.shape_cast %8 : vector<1x8x64xbf16> to vector<8x64xbf16>
    %c1_10 = arith.constant 1 : index
    %c0_11 = arith.constant 0 : index
    %c0_12 = arith.constant 0 : index
    %10 = vector.load %arg2[%c1_10, %c0_11, %c0_12] : memref<4x64x32xbf16, #tpu.memory_space<vmem>>, vector<1x64x32xbf16>
    %11 = vector.shape_cast %10 : vector<1x64x32xbf16> to vector<64x32xbf16>
    %cst_13 = arith.constant dense<0.000000e+00> : vector<8x32xf32>
    %12 = tpu.matmul %9, %11, %cst_13 {dimension_numbers = #tpu.dot_dimension_numbers<[1], [0], [0], [1], [0, 0, 1, 1], [], []>} : vector<8x64xbf16>, vector<64x32xbf16>, vector<8x32xf32> -> vector<8x32xf32>
    %13 = arith.addf %7, %12 : vector<8x32xf32>
    %c0_14 = arith.constant 0 : index
    %c3 = arith.constant 3 : index
    %c0_15 = arith.constant 0 : index
    %14 = vector.load %arg1[%c0_14, %c3, %c0_15] : memref<2x15x64xbf16, #tpu.memory_space<vmem>>, vector<1x8x64xbf16>
    %15 = vector.shape_cast %14 : vector<1x8x64xbf16> to vector<8x64xbf16>
    %c2 = arith.constant 2 : index
    %c0_16 = arith.constant 0 : index
    %c0_17 = arith.constant 0 : index
    %16 = vector.load %arg2[%c2, %c0_16, %c0_17] : memref<4x64x32xbf16, #tpu.memory_space<vmem>>, vector<1x64x32xbf16>
    %17 = vector.shape_cast %16 : vector<1x64x32xbf16> to vector<64x32xbf16>
    %cst_18 = arith.constant dense<0.000000e+00> : vector<8x32xf32>
    %18 = tpu.matmul %15, %17, %cst_18 {dimension_numbers = #tpu.dot_dimension_numbers<[1], [0], [0], [1], [0, 0, 1, 1], [], []>} : vector<8x64xbf16>, vector<64x32xbf16>, vector<8x32xf32> -> vector<8x32xf32>
    %19 = arith.addf %13, %18 : vector<8x32xf32>
    %c0_19 = arith.constant 0 : index
    %c4 = arith.constant 4 : index
    %c0_20 = arith.constant 0 : index
    %20 = vector.load %arg1[%c0_19, %c4, %c0_20] : memref<2x15x64xbf16, #tpu.memory_space<vmem>>, vector<1x8x64xbf16>
    %21 = vector.shape_cast %20 : vector<1x8x64xbf16> to vector<8x64xbf16>
    %c3_21 = arith.constant 3 : index
    %c0_22 = arith.constant 0 : index
    %c0_23 = arith.constant 0 : index
    %22 = vector.load %arg2[%c3_21, %c0_22, %c0_23] : memref<4x64x32xbf16, #tpu.memory_space<vmem>>, vector<1x64x32xbf16>
    %23 = vector.shape_cast %22 : vector<1x64x32xbf16> to vector<64x32xbf16>
    %cst_24 = arith.constant dense<0.000000e+00> : vector<8x32xf32>
    %24 = tpu.matmul %21, %23, %cst_24 {dimension_numbers = #tpu.dot_dimension_numbers<[1], [0], [0], [1], [0, 0, 1, 1], [], []>} : vector<8x64xbf16>, vector<64x32xbf16>, vector<8x32xf32> -> vector<8x32xf32>
    %25 = arith.addf %19, %24 : vector<8x32xf32>
    %26 = vector.broadcast %0 : vector<1x32xf32> to vector<8x32xf32>
    %27 = arith.addf %25, %26 : vector<8x32xf32>
    %cst_25 = arith.constant 0.000000e+00 : f32
    %28 = vector.broadcast %cst_25 : f32 to vector<8x32xf32>
    %29 = arith.maximumf %27, %28 : vector<8x32xf32>
    %30 = arith.truncf %29 : vector<8x32xf32> to vector<8x32xbf16>
    %c0_26 = arith.constant 0 : index
    %c0_27 = arith.constant 0 : index
    %c0_28 = arith.constant 0 : index
    %31 = vector.load %arg4[%c0_26, %c0_27, %c0_28] : memref<2x8x32xbf16, #tpu.memory_space<vmem>>, vector<1x8x32xbf16>
    %32 = vector.shape_cast %31 : vector<1x8x32xbf16> to vector<8x32xbf16>
    %33 = vector.shape_cast %30 : vector<8x32xbf16> to vector<1x8x32xbf16>
    tpu.vector_store %arg4[%c0_26, %c0_27, %c0_28], %33 {strides = array<i32>} : memref<2x8x32xbf16, #tpu.memory_space<vmem>>, vector<1x8x32xbf16>,
    %cst_29 = arith.constant 0.000000e+00 : f32
    %34 = vector.broadcast %cst_29 : f32 to vector<8x32xf32>
    %c1_30 = arith.constant 1 : index
    %c0_31 = arith.constant 0 : index
    %c0_32 = arith.constant 0 : index
    %35 = vector.load %arg1[%c1_30, %c0_31, %c0_32] : memref<2x15x64xbf16, #tpu.memory_space<vmem>>, vector<1x8x64xbf16>
    %36 = vector.shape_cast %35 : vector<1x8x64xbf16> to vector<8x64xbf16>
    %c0_33 = arith.constant 0 : index
    %c0_34 = arith.constant 0 : index
    %c0_35 = arith.constant 0 : index
    %37 = vector.load %arg2[%c0_33, %c0_34, %c0_35] : memref<4x64x32xbf16, #tpu.memory_space<vmem>>, vector<1x64x32xbf16>
    %38 = vector.shape_cast %37 : vector<1x64x32xbf16> to vector<64x32xbf16>
    %cst_36 = arith.constant dense<0.000000e+00> : vector<8x32xf32>
    %39 = tpu.matmul %36, %38, %cst_36 {dimension_numbers = #tpu.dot_dimension_numbers<[1], [0], [0], [1], [0, 0, 1, 1], [], []>} : vector<8x64xbf16>, vector<64x32xbf16>, vector<8x32xf32> -> vector<8x32xf32>
    %40 = arith.addf %34, %39 : vector<8x32xf32>
    %c1_37 = arith.constant 1 : index
    %c1_38 = arith.constant 1 : index
    %c0_39 = arith.constant 0 : index
    %41 = vector.load %arg1[%c1_37, %c1_38, %c0_39] : memref<2x15x64xbf16, #tpu.memory_space<vmem>>, vector<1x8x64xbf16>
    %42 = vector.shape_cast %41 : vector<1x8x64xbf16> to vector<8x64xbf16>
    %c1_40 = arith.constant 1 : index
    %c0_41 = arith.constant 0 : index
    %c0_42 = arith.constant 0 : index
    %43 = vector.load %arg2[%c1_40, %c0_41, %c0_42] : memref<4x64x32xbf16, #tpu.memory_space<vmem>>, vector<1x64x32xbf16>
    %44 = vector.shape_cast %43 : vector<1x64x32xbf16> to vector<64x32xbf16>
    %cst_43 = arith.constant dense<0.000000e+00> : vector<8x32xf32>
    %45 = tpu.matmul %42, %44, %cst_43 {dimension_numbers = #tpu.dot_dimension_numbers<[1], [0], [0], [1], [0, 0, 1, 1], [], []>} : vector<8x64xbf16>, vector<64x32xbf16>, vector<8x32xf32> -> vector<8x32xf32>
    %46 = arith.addf %40, %45 : vector<8x32xf32>
    %c1_44 = arith.constant 1 : index
    %c3_45 = arith.constant 3 : index
    %c0_46 = arith.constant 0 : index
    %47 = vector.load %arg1[%c1_44, %c3_45, %c0_46] : memref<2x15x64xbf16, #tpu.memory_space<vmem>>, vector<1x8x64xbf16>
    %48 = vector.shape_cast %47 : vector<1x8x64xbf16> to vector<8x64xbf16>
    %c2_47 = arith.constant 2 : index
    %c0_48 = arith.constant 0 : index
    %c0_49 = arith.constant 0 : index
    %49 = vector.load %arg2[%c2_47, %c0_48, %c0_49] : memref<4x64x32xbf16, #tpu.memory_space<vmem>>, vector<1x64x32xbf16>
    %50 = vector.shape_cast %49 : vector<1x64x32xbf16> to vector<64x32xbf16>
    %cst_50 = arith.constant dense<0.000000e+00> : vector<8x32xf32>
    %51 = tpu.matmul %48, %50, %cst_50 {dimension_numbers = #tpu.dot_dimension_numbers<[1], [0], [0], [1], [0, 0, 1, 1], [], []>} : vector<8x64xbf16>, vector<64x32xbf16>, vector<8x32xf32> -> vector<8x32xf32>
    %52 = arith.addf %46, %51 : vector<8x32xf32>
    %c1_51 = arith.constant 1 : index
    %c4_52 = arith.constant 4 : index
    %c0_53 = arith.constant 0 : index
    %53 = vector.load %arg1[%c1_51, %c4_52, %c0_53] : memref<2x15x64xbf16, #tpu.memory_space<vmem>>, vector<1x8x64xbf16>
    %54 = vector.shape_cast %53 : vector<1x8x64xbf16> to vector<8x64xbf16>
    %c3_54 = arith.constant 3 : index
    %c0_55 = arith.constant 0 : index
    %c0_56 = arith.constant 0 : index
    %55 = vector.load %arg2[%c3_54, %c0_55, %c0_56] : memref<4x64x32xbf16, #tpu.memory_space<vmem>>, vector<1x64x32xbf16>
    %56 = vector.shape_cast %55 : vector<1x64x32xbf16> to vector<64x32xbf16>
    %cst_57 = arith.constant dense<0.000000e+00> : vector<8x32xf32>
    %57 = tpu.matmul %54, %56, %cst_57 {dimension_numbers = #tpu.dot_dimension_numbers<[1], [0], [0], [1], [0, 0, 1, 1], [], []>} : vector<8x64xbf16>, vector<64x32xbf16>, vector<8x32xf32> -> vector<8x32xf32>
    %58 = arith.addf %52, %57 : vector<8x32xf32>
    %59 = vector.broadcast %0 : vector<1x32xf32> to vector<8x32xf32>
    %60 = arith.addf %58, %59 : vector<8x32xf32>
    %cst_58 = arith.constant 0.000000e+00 : f32
    %61 = vector.broadcast %cst_58 : f32 to vector<8x32xf32>
    %62 = arith.maximumf %60, %61 : vector<8x32xf32>
    %63 = arith.truncf %62 : vector<8x32xf32> to vector<8x32xbf16>
    %c1_59 = arith.constant 1 : index
    %c0_60 = arith.constant 0 : index
    %c0_61 = arith.constant 0 : index
    %64 = vector.load %arg4[%c1_59, %c0_60, %c0_61] : memref<2x8x32xbf16, #tpu.memory_space<vmem>>, vector<1x8x32xbf16>
    %65 = vector.shape_cast %64 : vector<1x8x32xbf16> to vector<8x32xbf16>
    %66 = vector.shape_cast %63 : vector<8x32xbf16> to vector<1x8x32xbf16>
    tpu.vector_store %arg4[%c1_59, %c0_60, %c0_61], %66 {strides = array<i32>} : memref<2x8x32xbf16, #tpu.memory_space<vmem>>, vector<1x8x32xbf16>,
    return
  }
  func.func @transform_0(%arg0: i32) -> (i32, i32, i32) {
    %c0_i32 = arith.constant 0 : i32
    %c0_i32_0 = arith.constant 0 : i32
    %c0_i32_1 = arith.constant 0 : i32
    return %arg0, %c0_i32, %c0_i32_0 : i32, i32, i32
  }
  func.func @transform_1(%arg0: i32) -> (i32, i32, i32) {
    %c0_i32 = arith.constant 0 : i32
    %c0_i32_0 = arith.constant 0 : i32
    %c0_i32_1 = arith.constant 0 : i32
    %c0_i32_2 = arith.constant 0 : i32
    return %c0_i32, %c0_i32_0, %c0_i32_1 : i32, i32, i32
  }
  func.func @transform_2(%arg0: i32) -> (i32, i32) {
    %c0_i32 = arith.constant 0 : i32
    %c0_i32_0 = arith.constant 0 : i32
    %c0_i32_1 = arith.constant 0 : i32
    return %c0_i32, %c0_i32_0 : i32, i32
  }
  func.func @transform_3(%arg0: i32) -> (i32, i32, i32) {
    %c0_i32 = arith.constant 0 : i32
    %c0_i32_0 = arith.constant 0 : i32
    %c0_i32_1 = arith.constant 0 : i32
    return %arg0, %c0_i32, %c0_i32_0 : i32, i32, i32
  }
}

module attributes {stable_mosaic.version = 11 : i64} {
  func.func @_fc_head_kernel(%arg0: i32, %arg1: memref<2x256xbf16, #tpu.memory_space<vmem>>, %arg2: memref<256x256xbf16, #tpu.memory_space<vmem>>, %arg3: memref<1x256xf32, #tpu.memory_space<vmem>>, %arg4: memref<256x128xbf16, #tpu.memory_space<vmem>>, %arg5: memref<1x128xf32, #tpu.memory_space<vmem>>, %arg6: memref<2x128xf32, #tpu.memory_space<vmem>>) attributes {dimension_semantics = [#tpu.dimension_semantics<parallel>], iteration_bounds = array<i64: 1>, scalar_prefetch = 0 : i64, scratch_operands = 0 : i64, tpu.core_type = #tpu.core_type<tc>, window_params = [{transform_indices = @transform_0, window_bounds = array<i64: 2, 256>}, {pipeline_mode = #tpu.pipeline_mode<synchronous>, transform_indices = @transform_1, window_bounds = array<i64: 256, 256>}, {pipeline_mode = #tpu.pipeline_mode<synchronous>, transform_indices = @transform_2, window_bounds = array<i64: 1, 256>}, {pipeline_mode = #tpu.pipeline_mode<synchronous>, transform_indices = @transform_3, window_bounds = array<i64: 256, 128>}, {pipeline_mode = #tpu.pipeline_mode<synchronous>, transform_indices = @transform_4, window_bounds = array<i64: 1, 128>}, {transform_indices = @transform_5, window_bounds = array<i64: 2, 128>}]} {
    %c0 = arith.constant 0 : index
    %c0_0 = arith.constant 0 : index
    %0 = vector.load %arg1[%c0, %c0_0] : memref<2x256xbf16, #tpu.memory_space<vmem>>, vector<2x256xbf16>
    %c0_1 = arith.constant 0 : index
    %c0_2 = arith.constant 0 : index
    %1 = vector.load %arg2[%c0_1, %c0_2] : memref<256x256xbf16, #tpu.memory_space<vmem>>, vector<256x256xbf16>
    %cst = arith.constant dense<0.000000e+00> : vector<2x256xf32>
    %2 = tpu.matmul %0, %1, %cst {dimension_numbers = #tpu.dot_dimension_numbers<[1], [0], [0], [1], [0, 0, 1, 1], [], []>} : vector<2x256xbf16>, vector<256x256xbf16>, vector<2x256xf32> -> vector<2x256xf32>
    %c0_3 = arith.constant 0 : index
    %c0_4 = arith.constant 0 : index
    %3 = vector.load %arg3[%c0_3, %c0_4] : memref<1x256xf32, #tpu.memory_space<vmem>>, vector<1x256xf32>
    %4 = vector.broadcast %3 : vector<1x256xf32> to vector<2x256xf32>
    %5 = arith.addf %2, %4 : vector<2x256xf32>
    %cst_5 = arith.constant 0.000000e+00 : f32
    %6 = vector.broadcast %cst_5 : f32 to vector<2x256xf32>
    %7 = arith.maximumf %5, %6 : vector<2x256xf32>
    %8 = arith.truncf %7 : vector<2x256xf32> to vector<2x256xbf16>
    %c0_6 = arith.constant 0 : index
    %c0_7 = arith.constant 0 : index
    %9 = vector.load %arg4[%c0_6, %c0_7] : memref<256x128xbf16, #tpu.memory_space<vmem>>, vector<256x128xbf16>
    %cst_8 = arith.constant dense<0.000000e+00> : vector<2x128xf32>
    %10 = tpu.matmul %8, %9, %cst_8 {dimension_numbers = #tpu.dot_dimension_numbers<[1], [0], [0], [1], [0, 0, 1, 1], [], []>} : vector<2x256xbf16>, vector<256x128xbf16>, vector<2x128xf32> -> vector<2x128xf32>
    %c0_9 = arith.constant 0 : index
    %c0_10 = arith.constant 0 : index
    %11 = vector.load %arg5[%c0_9, %c0_10] : memref<1x128xf32, #tpu.memory_space<vmem>>, vector<1x128xf32>
    %12 = vector.broadcast %11 : vector<1x128xf32> to vector<2x128xf32>
    %13 = arith.addf %10, %12 : vector<2x128xf32>
    %c0_11 = arith.constant 0 : index
    %c0_12 = arith.constant 0 : index
    %14 = vector.load %arg6[%c0_11, %c0_12] : memref<2x128xf32, #tpu.memory_space<vmem>>, vector<2x128xf32>
    tpu.vector_store %arg6[%c0_11, %c0_12], %13 {strides = array<i32>} : memref<2x128xf32, #tpu.memory_space<vmem>>, vector<2x128xf32>,
    return
  }
  func.func @transform_0(%arg0: i32) -> (i32, i32) {
    %c0_i32 = arith.constant 0 : i32
    %c0_i32_0 = arith.constant 0 : i32
    return %arg0, %c0_i32 : i32, i32
  }
  func.func @transform_1(%arg0: i32) -> (i32, i32) {
    %c0_i32 = arith.constant 0 : i32
    %c0_i32_0 = arith.constant 0 : i32
    %c0_i32_1 = arith.constant 0 : i32
    return %c0_i32, %c0_i32_0 : i32, i32
  }
  func.func @transform_2(%arg0: i32) -> (i32, i32) {
    %c0_i32 = arith.constant 0 : i32
    %c0_i32_0 = arith.constant 0 : i32
    %c0_i32_1 = arith.constant 0 : i32
    return %c0_i32, %c0_i32_0 : i32, i32
  }
  func.func @transform_3(%arg0: i32) -> (i32, i32) {
    %c0_i32 = arith.constant 0 : i32
    %c0_i32_0 = arith.constant 0 : i32
    %c0_i32_1 = arith.constant 0 : i32
    return %c0_i32, %c0_i32_0 : i32, i32
  }
  func.func @transform_4(%arg0: i32) -> (i32, i32) {
    %c0_i32 = arith.constant 0 : i32
    %c0_i32_0 = arith.constant 0 : i32
    %c0_i32_1 = arith.constant 0 : i32
    return %c0_i32, %c0_i32_0 : i32, i32
  }
  func.func @transform_5(%arg0: i32) -> (i32, i32) {
    %c0_i32 = arith.constant 0 : i32
    %c0_i32_0 = arith.constant 0 : i32
    return %arg0, %c0_i32 : i32, i32
  }
}

</mosaic_0001>

<bundles_post_ra>
// kernel: conv_model_forward.3
= control target key start
LH: loop header
LB: loop body
LE: loop exit
PB: predicated region body
PF: predicated region fallthrough
CT: control target
= control target key end

     0   :  { %vm61_vm0 = vsmask.f32 7424  ;;  %vm117_vm1 = vcmask 523264   ;;  %vm639_vm2 = vcmask 125952   ;;  %s2143_s1 = inlined_call_operand.vmem [shape: bf16[4,64,16], index: 1, kind: input, shape index: {}]   ;;  %s2144_s0 = inlined_call_operand.vmem [shape: bf16[2,72,64], index: 0, kind: input, shape index: {}]   ;;  %s2145_s2 = inlined_call_operand.vmem [shape: f32[1,16], index: 2, kind: input, shape index: {}]   ;;  %s2146_s3 = inlined_call_operand.vmem [shape: bf16[2,56,16], index: 3, kind: output, shape index: {}]  }
   0x1   :  { %v1679_v0 = vld [vmem:[%s2143_s1 + $0x20] sm:$0xff]   ;;  %v1681_v2 = vld [vmem:[%s2143_s1 + $0x28] sm:$0xff]   ;;  %v1683_v4 = vld [vmem:[%s2143_s1 + $0x30] sm:$0xff]  }
   0x2   :  { %v1680_v1 = vld [vmem:[%s2143_s1 + $0x20] sm:$0xff]   ;;  %1527 = vmatprep.subr.bf16.mxu0 %v1679_v0  ;;  %v1682_v3 = vld [vmem:[%s2143_s1 + $0x28] sm:$0xff]   ;;  %v1684_v5 = vld [vmem:[%s2143_s1 + $0x30] sm:$0xff]  }
   0x3   :  { %1591 = vmatprep.subr.bf16.mxu1 %v1680_v1  ;;  %1528 = vmatpush3.bf16.msra.mxu0 %v1679_v0  ;;  %v1685_v6 = vld [vmem:[%s2143_s1 + $0x38] sm:$0xff]   ;;  %v16_v8 = vld [vmem:[%s2144_s0] sm:$0xf]  ;;  %v1787_v9 = vld [vmem:[%s2144_s0 + $0x4] sm:$0xf] }
   0x4   :  { %1592 = vmatpush3.bf16.msra.mxu1 %v1680_v1  ;;  %1529 = vmatprep.subr.bf16.mxu0 %v1681_v2  ;;  %v1686_v7 = vld [vmem:[%s2143_s1 + $0x38] sm:$0xff]   ;;  %v1792_v10 = vld [vmem:[%s2144_s0 + $0x8] sm:$0xf]  ;;  %v1797_v11 = vld [vmem:[%s2144_s0 + $0xc] sm:$0xf]  ;;  %v1805_v13 = vcombine.low %v16_v8, %v1787_v9 }
   0x5   :  { %1593 = vmatprep.subr.bf16.mxu1 %v1682_v3  ;;  %v1802_v12 = vld [vmem:[%s2144_s0 + $0x10] sm:$0xf]  ;;  %v1349_v14 = vld [vmem:[%s2144_s0 + $0x24] sm:$0xf]  ;;  %v1812_v15 = vcombine.low %v1792_v10, %v1797_v11  ;;  %v1817_v16 = vld [vmem:[%s2144_s0 + $0x28] sm:$0xf] }
   0x6   :  { %v1822_v17 = vld [vmem:[%s2144_s0 + $0x2c] sm:$0xf]  ;;  %v1827_v18 = vld [vmem:[%s2144_s0 + $0x30] sm:$0xf]  ;;  %v63_v19 = vshrl.u32 %v1805_v13, 16  ;;  %v65_v20 = vshll.u32 %v1805_v13, 16  ;;  %v1837_v22 = vcombine.low %v1349_v14, %v1817_v16 }
   0x7   :  { %1530 = vmatpush3.bf16.msra.mxu0 %v1681_v2  ;;  %v1834_v21 = vld [vmem:[%s2144_s0 + $0x34] sm:$0xf]  ;;  %v1841_v23 = vcombine.low %v1822_v17, %v1827_v18  ;;  %v70_v25 = vshll.u32 %v1812_v15, 16  ;;  %v74_v26 = vshrl.u32 %v1812_v15, 16  ;;  %v1694_v32 = vld [vmem:[%s2143_s1] sm:$0xff]   ;;  %v1697_v48 = vld [vmem:[%s2143_s1 + $0x8] sm:$0xff]  }
   0x8   :  { %1594 = vmatpush3.bf16.msra.mxu1 %v1682_v3  ;;  %1531 = vmatprep.subr.bf16.mxu0 %v1683_v4  ;;  %v1846_v24 = vld [vmem:[%s2144_s0 + $0x14] sm:$0xf]  ;;  %v67_v28 = vrot.slane %v65_v20, 1  ;;  %v693_v29 = vshrl.u32 %v1837_v22, 16  ;;  %v695_v30 = vshll.u32 %v1837_v22, 16  ;;  %v1696_v33 = vld [vmem:[%s2143_s1] sm:$0xff]  }
   0x9   :  { %1595 = vmatprep.subr.bf16.mxu1 %v1684_v5  ;;  %v1852_v27 = vcombine.low %v1802_v12, %v1846_v24  ;;  %v700_v31 = vshll.u32 %v1841_v23, 16  ;;  %v72_v34 = vrot.slane %v70_v25, 1  ;;  %v704_v35 = vshrl.u32 %v1841_v23, 16  ;;  %v1868_v37 = vld [vmem:[%s2144_s0 + $0x38] sm:$0xf]  ;;  %v1698_v50 = vld [vmem:[%s2143_s1 + $0x8] sm:$0xff]  }
   0xa   :  { %v68_v38 = vor.u32 %v67_v28, %v63_v19  ;;  %v697_v39 = vrot.slane %v695_v30, 1  ;;  %v1872_v41 = vcombine.low %v1834_v21, %v1868_v37  ;;  %v1887_v51 = vld [vmem:[%s2144_s0 + $0x18] sm:$0xf]  ;;  %v31_v52 = vld [vmem:[%s2144_s0 + $0x1c] sm:$0x1]  ;;  %v1701_v60 = vld [vmem:[%s2143_s1 + $0x10] sm:$0xff]  }
   0xb   :  { %1532 = vmatpush3.bf16.msra.mxu0 %v1683_v4  ;;  %v78_v36 = vshll.u32 %v1852_v27, 16  ;;  %v702_v40 = vrot.slane %v700_v31, 1  ;;  %v76_v42 = vor.u32 %v74_v26, %v72_v34  ;;  %v82_v53 = vshrl.u32 %v1852_v27, 16  ;;  %v1900_v58 = vld [vmem:[%s2144_s0 + $0x3c] sm:$0xf]  ;;  %v1705_v28 = vld [vmem:[%s2143_s1 + $0x40] sm:$0xff]  }
   0xc   :  { %1596 = vmatpush3.bf16.msra.mxu1 %v1684_v5  ;;  %1533 = vmatprep.subr.bf16.mxu0 %v1685_v6  ;;  %v73_v44 = vsel %vm61_vm0, %v68_v38, %v72_v34  ;;  %v698_v45 = vor.u32 %v697_v39, %v693_v29  ;;  %v708_v47 = vshll.u32 %v1872_v41, 16  ;;  %v712_v54 = vshrl.u32 %v1872_v41, 16  ;;  %v1356_v59 = vld [vmem:[%s2144_s0 + $0x40] sm:$0x1]  ;;  %v1703_v25 = vld [vmem:[%s2143_s1 + $0x18] sm:$0xff]   ;;  %v1710_v30 = vld [vmem:[%s2143_s1 + $0x50] sm:$0xff]  }
   0xd   :  { %1597 = vmatprep.subr.bf16.mxu1 %v1686_v7  ;;  %v80_v43 = vrot.slane %v78_v36, 1  ;;  %v706_v46 = vor.u32 %v704_v35, %v702_v40  ;;  %1535 = vmatprep.mubr.msk.bf16.mxu0 %vm117_vm1, %v73_v44  ;;  %v1283_v57 = vcombine.low %v1887_v51, %v31_v52  ;;  %v1368_v61 = vcombine.low %v1900_v58, %v1356_v59  ;;  %v1704_v26 = vld [vmem:[%s2143_s1 + $0x18] sm:$0xff]   ;;  %v1706_v29 = vld [vmem:[%s2143_s1 + $0x40] sm:$0xff]   ;;  %v1997_v39 = vld [vmem:[%s2144_s0 + $0x30] sm:$0xff]  }
   0xe   :  { %v703_v55 = vsel %vm61_vm0, %v698_v45, %v702_v40  ;;  %v710_v56 = vrot.slane %v708_v47, 1  ;;  %v1377_v31 = vcombine.low %v1900_v58, %v1900_v58  ;;  %v1395_v34 = vcombine.low %v1817_v16, %v1822_v17  ;;  %v1717_v16 = vld [vmem:[%s2143_s1 + $0x60] sm:$0xff]   ;;  %v1986_v17 = vld [vmem:[%s2144_s0 + $0xc] sm:$0xff]   ;;  %v1733_v47 = vld [vmem:[%s2144_s0 + $0x14] sm:$0xff]  }
   0xf   :  { %1534 = vmatpush3.bf16.msra.mxu0 %v1685_v6  ;;  %v81_v49 = vsel %vm61_vm0, %v76_v42, %v80_v43  ;;  %1599 = vmatprep.mubr.msk.bf16.mxu1 %vm117_vm1, %v703_v55  ;;  %v84_v63 = vor.u32 %v82_v53, %v80_v43  ;;  %v86_v0 = vshll.u32 %v1283_v57, 16  ;;  %v90_v1 = vshrl.u32 %v1283_v57, 16  ;;  %v1718_v36 = vld [vmem:[%s2143_s1 + $0x60] sm:$0xff]   ;;  %v1719_v43 = vld [vmem:[%s2143_s1 + $0x68] sm:$0xff]   ;;  %v1723_v52 = vld [vmem:[%s2144_s0 + $0x1c] ss:$0 sps:$4 sm:$0xff]  }
  0x10   :  { %1598 = vmatpush3.bf16.msra.mxu1 %v1686_v7  ;;  %1543 = vmatprep.subr.bf16.mxu0 %v1694_v32  ;;  %v711_v62 = vsel %vm61_vm0, %v706_v46, %v710_v56  ;;  %v714_v2 = vor.u32 %v712_v54, %v710_v56  ;;  %v716_v3 = vshll.u32 %v1368_v61, 16  ;;  %v720_v4 = vshrl.u32 %v1368_v61, 16  ;;  %v1702_v7 = vld [vmem:[%s2143_s1 + $0x10] sm:$0xff]   ;;  %v1736_v57 = vld [vmem:[%s2144_s0 + $0x40] sm:$0x1f]  }
  0x11   :  { %1607 = vmatprep.subr.bf16.mxu1 %v1696_v33  ;;  %v88_v5 = vrot.slane %v86_v0, 1  ;;  %v1310_v38 = vcombine.low %v1797_v11, %v1802_v12  ;;  %v1396_v42 = vcombine.low %v1827_v18, %v1834_v21  ;;  %v460_v44 = vshll.u32 %v1986_v17, 16  ;;  %v1720_v18 = vld [vmem:[%s2143_s1 + $0x68] sm:$0xff]   ;;  %v1726_v53 = vld [vmem:[%s2143_s1 + $0x70] sm:$0xff]   ;;  %v1725_v59 = vld [vmem:[%s2144_s0 + $0x40] ss:$0 sps:$4 sm:$0xff]  }
  0x12   :  { %1536 = vmatmul.mubr.msk.bf16.vlgmr.msra.gmra.mrb[0].mxu0 %vm117_vm1, %v81_v49  ;;  %v718_v6 = vrot.slane %v716_v3, 1  ;;  %v1397_v45 = vcombine.low %v1868_v37, %v1900_v58  ;;  %v1087_v46 = vshll.u32 %v1997_v39, 16  ;;  %v1724_v37 = vld [vmem:[%s2143_s1 + $0x70] sm:$0xff]   ;;  %v468_v56 = vshll.u32 %v1733_v47, 16 }
  0x13   :  { %1544 = vmatpush3.bf16.msra.mxu0 %v1694_v32  ;;  %1600 = vmatmul.mubr.msk.bf16.vlgmr.msra.gmra.mrb[0].mxu1 %vm117_vm1, %v711_v62  ;;  %v89_v8 = vsel %vm61_vm0, %v84_v63, %v88_v5  ;;  %v92_v14 = vor.u32 %v90_v1, %v88_v5  ;;  %v1713_v32 = vld [vmem:[%s2143_s1 + $0x58] sm:$0xff]   ;;  %v462_v49 = vrot.slane %v460_v44, 1  ;;  %v464_v58 = vshrl.u32 %v1986_v17, 16 }
  0x14   :  { %1545 = vmatprep.subr.bf16.mxu0 %v1697_v48  ;;  %1608 = vmatpush3.bf16.msra.mxu1 %v1696_v33  ;;  %v719_v19 = vsel %vm61_vm0, %v714_v2, %v718_v6  ;;  %v722_v20 = vor.u32 %v720_v4, %v718_v6  ;;  %v1729_v33 = vld [vmem:[%s2144_s0 + $0x4] sm:$0xff]   ;;  %v1089_v55 = vrot.slane %v1087_v46, 1  ;;  %v472_v63 = vshrl.u32 %v1733_v47, 16  ;;  %v1728_v2 = vld [vmem:[%s2143_s1 + $0x78] sm:$0xff]  }
  0x15   :  { %1609 = vmatprep.subr.bf16.mxu1 %v1698_v50  ;;  %1539 = vmatprep.mubr.msk.bf16.mxu0 %vm117_vm1, %v89_v8  ;;  %v455_v35 = vshll.u32 %v1729_v33, 16  ;;  %v453_v11 = vshrl.u32 %v1729_v33, 16  ;;  %v1091_v1 = vshrl.u32 %v1997_v39, 16  ;;  %v470_v4 = vrot.slane %v468_v56, 1 }
  0x16   :  { %1603 = vmatprep.mubr.msk.bf16.mxu1 %vm117_vm1, %v719_v19  ;;  %v1103_v6 = vshll.u32 %v1736_v57, 16 }
  0x17   :  { %1546 = vmatpush3.bf16.msra.mxu0 %v1697_v48  ;;  %v457_v12 = vrot.slane %v455_v35, 1 }
  0x18   :  { %1547 = vmatprep.subr.bf16.mxu0 %v1701_v60  ;;  %1610 = vmatpush3.bf16.msra.mxu1 %v1698_v50  ;;  %v1734_v50 = vld [vmem:[%s2144_s0 + $0x38] sm:$0xff]  }
  0x19   :  { %1611 = vmatprep.subr.bf16.mxu1 %v1702_v7  ;;  %v458_v48 = vor.u32 %v457_v12, %v453_v11  ;;  %v1095_v62 = vshll.u32 %v1734_v50, 16  ;;  %v1099_v5 = vshrl.u32 %v1734_v50, 16 }
  0x1a   :  { %1540 = vmatmul.mubr.msk.bf16.gmra.mrb[4].mxu0 %vm117_vm1, %v92_v14  ;;  %v474_v14 = vor.u32 %v472_v63, %v470_v4 }
  0x1b   :  { %1548 = vmatpush3.bf16.msra.mxu0 %v1701_v60  ;;  %1551 = vmatprep.mubr.msk.bf16.mxu0 %vm117_vm1, %v1805_v13  ;;  %v1707_v13 = vld [vmem:[%s2143_s1 + $0x48] sm:$0xff]   ;;  %v1727_v60 = vld [vmem:[%s2143_s1 + $0x78] sm:$0xff]   ;;  %v463_v61 = vsel %vm61_vm0, %v458_v48, %v462_v49  ;;  %v1097_v8 = vrot.slane %v1095_v62, 1 }
  0x1c   :  { %1604 = vmatmul.mubr.msk.bf16.gmra.mrb[4].mxu1 %vm117_vm1, %v722_v20  ;;  %1549 = vmatprep.subr.bf16.mxu0 %v1703_v25  ;;  %v1093_v20 = vor.u32 %v1091_v1, %v1089_v55 }
  0x1d   :  { %1612 = vmatpush3.bf16.msra.mxu1 %v1702_v7  ;;  %1615 = vmatprep.mubr.msk.bf16.mxu1 %vm117_vm1, %v1837_v22  ;;  %v1708_v22 = vld [vmem:[%s2143_s1 + $0x48] sm:$0xff]   ;;  %v466_v7 = vor.u32 %v464_v58, %v462_v49  ;;  %v2070_v58 = vld [vmem:[%s2145_s2] ss:$0 sm:$0xff] }
  0x1e   :  { %1613 = vmatprep.subr.bf16.mxu1 %v1704_v26 }
  0x1f   :  { %1550 = vmatpush3.bf16.msra.mxu0 %v1703_v25  ;;  %v1101_v25 = vor.u32 %v1099_v5, %v1097_v8 }
  0x20   :  { %1559 = vmatprep.subr.bf16.mxu0 %v1705_v28 }
  0x21   :  { %1614 = vmatpush3.bf16.msra.mxu1 %v1704_v26  ;;  %v1105_v26 = vrot.slane %v1103_v6, 1 }
  0x22   :  { %1552 = vmatmul.mubr.msk.bf16.vlgmr.msra.gmra.mrb[0].mxu0 %vm117_vm1, %v1812_v15  ;;  %1623 = vmatprep.subr.bf16.mxu1 %v1706_v29  ;;  %v1292_v15 = vcombine.low %v1887_v51, %v1887_v51 }
  0x23   :  { %1560 = vmatpush3.bf16.msra.mxu0 %v1705_v28  ;;  %1555 = vmatprep.mubr.msk.bf16.mxu0 %vm117_vm1, %v1852_v27  ;;  %v1712_v27 = vld [vmem:[%s2143_s1 + $0x50] sm:$0xff]   ;;  %v471_v28 = vsel %vm61_vm0, %v466_v7, %v470_v4 }
  0x24   :  { %1616 = vmatmul.mubr.msk.bf16.vlgmr.msra.gmra.mrb[0].mxu1 %vm117_vm1, %v1841_v23  ;;  %1561 = vmatprep.subr.bf16.mxu0 %v1707_v13  ;;  %v1309_v23 = vcombine.low %v1787_v9, %v1792_v10  ;;  %v1714_v9 = vld [vmem:[%s2143_s1 + $0x58] sm:$0xff]   ;;  %v1731_v10 = vld [vmem:[%s2144_s0 + $0x28] sm:$0xff]  }
  0x25   :  { %1624 = vmatpush3.bf16.msra.mxu1 %v1706_v29  ;;  %1619 = vmatprep.mubr.msk.bf16.mxu1 %vm117_vm1, %v1872_v41  ;;  %v1082_v40 = vshll.u32 %v1731_v10, 16  ;;  %v1311_v41 = vcombine.low %v1846_v24, %v1887_v51  ;;  %v1080_v21 = vshrl.u32 %v1731_v10, 16  ;;  %v1735_v51 = vld [vmem:[%s2144_s0 + $0x1c] sm:$0x1f]  }
  0x26   :  { %1625 = vmatprep.subr.bf16.mxu1 %v1708_v22  ;;  %v476_v0 = vshll.u32 %v1735_v51, 16 }
  0x27   :  { %1562 = vmatpush3.bf16.msra.mxu0 %v1707_v13  ;;  %v1084_v24 = vrot.slane %v1082_v40, 1  ;;  %v1098_v13 = vsel %vm61_vm0, %v1093_v20, %v1097_v8 }
  0x28   :  { %1563 = vmatprep.subr.bf16.mxu0 %v1710_v30  ;;  %v478_v19 = vrot.slane %v476_v0, 1 }
  0x29   :  { %1626 = vmatpush3.bf16.msra.mxu1 %v1708_v22  ;;  %v1085_v54 = vor.u32 %v1084_v24, %v1080_v21  ;;  %v1106_v22 = vsel %vm61_vm0, %v1101_v25, %v1105_v26 }
  0x2a   :  { %1556 = vmatmul.mubr.msk.bf16.gmra.mrb[8].mxu0 %vm117_vm1, %v1292_v15  ;;  %1627 = vmatprep.subr.bf16.mxu1 %v1712_v27  ;;  %v479_v29 = vsel %vm61_vm0, %v474_v14, %v478_v19  ;;  %v1107_v15 = vshrl.u32 %v1736_v57, 16 }
  0x2b   :  { %1564 = vmatpush3.bf16.msra.mxu0 %v1710_v30  ;;  %1567 = vmatprep.mubr.msk.bf16.mxu0 %vm117_vm1, %v1309_v23  ;;  %v1090_v3 = vsel %vm61_vm0, %v1085_v54, %v1089_v55  ;;  %v480_v30 = vshrl.u32 %v1735_v51, 16 }
  0x2c   :  { %1620 = vmatmul.mubr.msk.bf16.gmra.mrb[8].mxu1 %vm117_vm1, %v1377_v31  ;;  %1565 = vmatprep.subr.bf16.mxu0 %v1713_v32  ;;  %v1109_v23 = vor.u32 %v1107_v15, %v1105_v26 }
  0x2d   :  { %1628 = vmatpush3.bf16.msra.mxu1 %v1712_v27  ;;  %1631 = vmatprep.mubr.msk.bf16.mxu1 %vm117_vm1, %v1395_v34  ;;  %v482_v27 = vor.u32 %v480_v30, %v478_v19 }
  0x2e   :  { %1629 = vmatprep.subr.bf16.mxu1 %v1714_v9 }
  0x2f   :  { %1566 = vmatpush3.bf16.msra.mxu0 %v1713_v32 }
  0x30   :  { %1575 = vmatprep.subr.bf16.mxu0 %v1717_v16 }
  0x31   :  { %1630 = vmatpush3.bf16.msra.mxu1 %v1714_v9 }
  0x32   :  { %1568 = vmatmul.mubr.msk.bf16.vlgmr.msra.gmra.mrb[0].mxu0 %vm117_vm1, %v1310_v38  ;;  %1639 = vmatprep.subr.bf16.mxu1 %v1718_v36 }
  0x33   :  { %1576 = vmatpush3.bf16.msra.mxu0 %v1717_v16  ;;  %1571 = vmatprep.mubr.msk.bf16.mxu0 %vm117_vm1, %v1311_v41 }
  0x34   :  { %1632 = vmatmul.mubr.msk.bf16.vlgmr.msra.gmra.mrb[0].mxu1 %vm117_vm1, %v1396_v42  ;;  %1577 = vmatprep.subr.bf16.mxu0 %v1719_v43 }
  0x35   :  { %1640 = vmatpush3.bf16.msra.mxu1 %v1718_v36  ;;  %1635 = vmatprep.mubr.msk.bf16.mxu1 %vm117_vm1, %v1397_v45 }
  0x36   :  { %1641 = vmatprep.subr.bf16.mxu1 %v1720_v18 }
  0x37   :  { %1578 = vmatpush3.bf16.msra.mxu0 %v1719_v43 }
  0x38   :  { %1579 = vmatprep.subr.bf16.mxu0 %v1724_v37 }
  0x39   :  { %1642 = vmatpush3.bf16.msra.mxu1 %v1720_v18 }
  0x3a   :  { %1572 = vmatmul.mubr.msk.bf16.gmra.mrb[12].mxu0 %vm117_vm1, %v1723_v52  ;;  %1643 = vmatprep.subr.bf16.mxu1 %v1726_v53 }
  0x3b   :  { %1580 = vmatpush3.bf16.msra.mxu0 %v1724_v37  ;;  %1583 = vmatprep.mubr.msk.bf16.mxu0 %vm117_vm1, %v463_v61 }
  0x3c   :  { %1636 = vmatmul.mubr.msk.bf16.gmra.mrb[12].mxu1 %vm117_vm1, %v1725_v59  ;;  %1581 = vmatprep.subr.bf16.mxu0 %v1727_v60 }
  0x3d   :  { %1644 = vmatpush3.bf16.msra.mxu1 %v1726_v53  ;;  %1647 = vmatprep.mubr.msk.bf16.mxu1 %vm117_vm1, %v1090_v3 }
  0x3e   :  { %1645 = vmatprep.subr.bf16.mxu1 %v1728_v2 }
  0x3f   :  { %1582 = vmatpush3.bf16.msra.mxu0 %v1727_v60 }
  0x41   :  { %1646 = vmatpush3.bf16.msra.mxu1 %v1728_v2 }
  0x42   :  { %1584 = vmatmul.mubr.msk.bf16.vlgmr.msra.gmra.mrb[0].mxu0 %vm117_vm1, %v471_v28 }
  0x43   :  { %1587 = vmatprep.mubr.msk.bf16.mxu0 %vm117_vm1, %v479_v29 }
  0x44   :  { %1648 = vmatmul.mubr.msk.bf16.vlgmr.msra.gmra.mrb[0].mxu1 %vm117_vm1, %v1098_v13 }
  0x45   :  { %1651 = vmatprep.mubr.msk.bf16.mxu1 %vm117_vm1, %v1106_v22 }
  0x4a   :  { %1588 = vmatmul.mubr.msk.bf16.gmra.mrb[16].mxu0 %vm117_vm1, %v482_v27 }
  0x4c   :  { %1652 = vmatmul.mubr.msk.bf16.gmra.mrb[16].mxu1 %vm117_vm1, %v1109_v23 }
  0xed   :  { %v1541_v31 = vpop.f32.mrb[4].mxu0 }
  0xee   :  { %v180_v32 = vpop.f32.mrb[5].mxu0 }
  0xef   :  { %v1605_v33 = vpop.f32.mrb[4].mxu1  ;;  %v1542_v34 = vpop.f32.mrb[6].mxu0 }
  0xf0   :  { %v809_v9 = vpop.f32.mrb[5].mxu1  ;;  %v183_v10 = vpop.f32.mrb[7].mxu0 }
  0xf1   :  { %v1606_v16 = vpop.f32.mrb[6].mxu1 }
  0xf2   :  { %v812_v17 = vpop.f32.mrb[7].mxu1 }
  0xfd   :  { %v1557_v35 = vpop.f32.mrb[8].mxu0 }
  0xfe   :  { %v287_v36 = vadd.f32 %v1557_v35, %v1541_v31  ;;  %v278_v38 = vpop.f32.mrb[9].mxu0 }
  0xff   :  { %v1621_v39 = vpop.f32.mrb[8].mxu1  ;;  %v279_v40 = vadd.f32 %v278_v38, %v180_v32  ;;  %v1558_v41 = vpop.f32.mrb[10].mxu0 }
 0x100   :  { %v916_v42 = vadd.f32 %v1621_v39, %v1605_v33  ;;  %v907_v43 = vpop.f32.mrb[9].mxu1  ;;  %v281_v11 = vpop.f32.mrb[11].mxu0 }
 0x101   :  { %v908_v12 = vadd.f32 %v907_v43, %v809_v9  ;;  %v1622_v44 = vpop.f32.mrb[10].mxu1  ;;  %v282_v45 = vadd.f32 %v281_v11, %v183_v10 }
 0x102   :  { %v910_v18 = vpop.f32.mrb[11].mxu1 }
 0x103   :  { %v911_v21 = vadd.f32 %v910_v18, %v812_v17 }
 0x10d   :  { %v1573_v24 = vpop.f32.mrb[12].mxu0 }
 0x10e   :  { %v414_v46 = vadd.f32 %v1573_v24, %v287_v36  ;;  %v394_v47 = vpop.f32.mrb[13].mxu0 }
 0x10f   :  { %v1637_v37 = vpop.f32.mrb[12].mxu1  ;;  %v412_v48 = vadd.f32 %v394_v47, %v279_v40  ;;  %v1574_v49 = vpop.f32.mrb[14].mxu0 }
 0x110   :  { %v1042_v50 = vadd.f32 %v1637_v37, %v916_v42  ;;  %v1022_v51 = vpop.f32.mrb[13].mxu1  ;;  %v397_v52 = vpop.f32.mrb[15].mxu0 }
 0x111   :  { %v1040_v53 = vadd.f32 %v1022_v51, %v908_v12  ;;  %v1638_v54 = vpop.f32.mrb[14].mxu1  ;;  %v413_v55 = vadd.f32 %v397_v52, %v282_v45 }
 0x112   :  { %v1025_v56 = vpop.f32.mrb[15].mxu1 }
 0x113   :  { %v2065_v57 = vadd.f32 %v1025_v56, %v911_v21 }
 0x115   :  { %v1585_v59 = vpop.f32.mrb[0].mxu0 }
 0x116   :  { %v598_v60 = vadd.f32 %v1585_v59, %v2070_v58  ;;  %v553_v61 = vpop.f32.mrb[1].mxu0 }
 0x117   :  { %v1649_v62 = vpop.f32.mrb[0].mxu1  ;;  %v596_v63 = vadd.f32 %v2070_v58, %v553_v61  ;;  %v1586_v0 = vpop.f32.mrb[2].mxu0 }
 0x118   :  { %v605_v1 = vmax.f32 %v598_v60, 0.0  ;;  %v1219_v2 = vadd.f32 %v1649_v62, %v2070_v58  ;;  %v1180_v3 = vpop.f32.mrb[1].mxu1  ;;  %v599_v4 = vadd.f32 %v1586_v0, %v2070_v58  ;;  %v556_v5 = vpop.f32.mrb[3].mxu0 }
 0x119   :  { %v603_v6 = vmax.f32 %v596_v63, 0.0  ;;  %v1217_v7 = vadd.f32 %v2070_v58, %v1180_v3  ;;  %v1650_v8 = vpop.f32.mrb[2].mxu1  ;;  %v597_v14 = vadd.f32 %v2070_v58, %v556_v5 }
 0x11a   :  { %v1451_v19 = vpack.c.bf16 %v605_v1, %v605_v1  ;;  %v1226_v20 = vmax.f32 %v1219_v2, 0.0  ;;  %v606_v25 = vmax.f32 %v599_v4, 0.0  ;;  %v1220_v26 = vadd.f32 %v1650_v8, %v2070_v58  ;;  %v1183_v28 = vpop.f32.mrb[3].mxu1 }
 0x11b   :  { %v1449_v29 = vpack.c.bf16 %v603_v6, %v603_v6  ;;  %v1224_v13 = vmax.f32 %v1217_v7, 0.0  ;;  %v604_v22 = vmax.f32 %v597_v14, 0.0  ;;  %v1218_v30 = vadd.f32 %v2070_v58, %v1183_v28 }
 0x11c   :  { %642 = vst.msk [vmem:[%s2146_s3 + $0x8] sm:$0xf] %vm639_vm2, %v1451_v19  ;;  %v1458_v15 = vpack.c.bf16 %v1226_v20, %v1226_v20  ;;  %v1452_v27 = vpack.c.bf16 %v606_v25, %v606_v25  ;;  %v1227_v23 = vmax.f32 %v1220_v26, 0.0 }
 0x11d   :  { %640 = vst.msk [vmem:[%s2146_s3] sm:$0xf] %vm639_vm2, %v1449_v29  ;;  %v1456_v31 = vpack.c.bf16 %v1224_v13, %v1224_v13  ;;  %v1450_v32 = vpack.c.bf16 %v604_v22, %v604_v22  ;;  %v1225_v33 = vmax.f32 %v1218_v30, 0.0  ;;  %v1589_v34 = vpop.f32.mrb[16].mxu0 }
 0x11e   :  { %1444 = vst.msk [vmem:[%s2146_s3 + $0x24] sm:$0xf] %vm639_vm2, %v1458_v15  ;;  %643 = vst.msk [vmem:[%s2146_s3 + $0xc] sm:$0xf] %vm639_vm2, %v1452_v27  ;;  %v1459_v9 = vpack.c.bf16 %v1227_v23, %v1227_v23  ;;  %v589_v10 = vadd.f32 %v1589_v34, %v414_v46  ;;  %v569_v16 = vpop.f32.mrb[17].mxu0 }
 0x11f   :  { %1442 = vst.msk [vmem:[%s2146_s3 + $0x1c] sm:$0xf] %vm639_vm2, %v1456_v31  ;;  %641 = vst.msk [vmem:[%s2146_s3 + $0x4] sm:$0xf] %vm639_vm2, %v1450_v32  ;;  %v1457_v17 = vpack.c.bf16 %v1225_v33, %v1225_v33  ;;  %v1653_v35 = vpop.f32.mrb[16].mxu1  ;;  %v587_v36 = vadd.f32 %v569_v16, %v412_v48  ;;  %v1590_v38 = vpop.f32.mrb[18].mxu0 }
 0x120   :  { %1445 = vst.msk [vmem:[%s2146_s3 + $0x28] sm:$0xf] %vm639_vm2, %v1459_v9  ;;  %v602_v39 = vadd.f32 %v2070_v58, %v589_v10  ;;  %v1216_v40 = vadd.f32 %v1653_v35, %v1042_v50  ;;  %v1196_v41 = vpop.f32.mrb[17].mxu1  ;;  %v572_v42 = vpop.f32.mrb[19].mxu0 }
 0x121   :  { %1443 = vst.msk [vmem:[%s2146_s3 + $0x20] sm:$0xf] %vm639_vm2, %v1457_v17  ;;  %v600_v43 = vadd.f32 %v2070_v58, %v587_v36  ;;  %v1214_v11 = vadd.f32 %v1196_v41, %v1040_v53  ;;  %v1654_v12 = vpop.f32.mrb[18].mxu1  ;;  %v588_v44 = vadd.f32 %v572_v42, %v413_v55 }
 0x122   :  { %v609_v45 = vmax.f32 %v602_v39, 0.0  ;;  %v1223_v18 = vadd.f32 %v2070_v58, %v1216_v40  ;;  %v1199_v21 = vpop.f32.mrb[19].mxu1 }
 0x123   :  { %v607_v24 = vmax.f32 %v600_v43, 0.0  ;;  %v1221_v46 = vadd.f32 %v2070_v58, %v1214_v11  ;;  %v601_v47 = vadd.f32 %v2070_v58, %v588_v44  ;;  %v1215_v37 = vadd.f32 %v1199_v21, %v2065_v57 }
 0x124   :  { %v1455_v48 = vpack.c.bf16 %v609_v45, %v609_v45  ;;  %v1230_v49 = vmax.f32 %v1223_v18, 0.0 }
 0x125   :  { %v1453_v50 = vpack.c.bf16 %v607_v24, %v607_v24  ;;  %v1228_v51 = vmax.f32 %v1221_v46, 0.0  ;;  %v608_v52 = vmax.f32 %v601_v47, 0.0  ;;  %v1222_v53 = vadd.f32 %v2070_v58, %v1215_v37 }
 0x126   :  { %646 = vst.msk [vmem:[%s2146_s3 + $0x18] sm:$0xf] %vm639_vm2, %v1455_v48  ;;  %v1462_v54 = vpack.c.bf16 %v1230_v49, %v1230_v49 }
 0x127   :  { %644 = vst.msk [vmem:[%s2146_s3 + $0x10] sm:$0xf] %vm639_vm2, %v1453_v50  ;;  %v1460_v55 = vpack.c.bf16 %v1228_v51, %v1228_v51  ;;  %v1454_v56 = vpack.c.bf16 %v608_v52, %v608_v52  ;;  %v1229_v57 = vmax.f32 %v1222_v53, 0.0 }
 0x128   :  { %1448 = vst.msk [vmem:[%s2146_s3 + $0x34] sm:$0xf] %vm639_vm2, %v1462_v54 }
 0x129   :  { %1446 = vst.msk [vmem:[%s2146_s3 + $0x2c] sm:$0xf] %vm639_vm2, %v1460_v55  ;;  %645 = vst.msk [vmem:[%s2146_s3 + $0x14] sm:$0xf] %vm639_vm2, %v1454_v56  ;;  %v1461_v58 = vpack.c.bf16 %v1229_v57, %v1229_v57 }
 0x12b   :  { %1447 = vst.msk [vmem:[%s2146_s3 + $0x30] sm:$0xf] %vm639_vm2, %v1461_v58 }

// kernel: conv_model_forward.5
= control target key start
LH: loop header
LB: loop body
LE: loop exit
PB: predicated region body
PF: predicated region fallthrough
CT: control target
= control target key end

     0   :  { %v57_v9 = vlaneseq  ;;  %v649_v10 = vmov 1966171168   ;;  %s860_s0 = inlined_call_operand.vmem [shape: bf16[2,256], index: 0, kind: input, shape index: {}]   ;;  %s861_s1 = inlined_call_operand.vmem [shape: bf16[256,256], index: 1, kind: input, shape index: {}]   ;;  %s862_s2 = inlined_call_operand.vmem [shape: f32[1,256], index: 2, kind: input, shape index: {}]   ;;  %s863_s3 = inlined_call_operand.vmem [shape: bf16[256,128], index: 3, kind: input, shape index: {}]   ;;  %s864_s4 = inlined_call_operand.vmem [shape: f32[1,128], index: 4, kind: input, shape index: {}]   ;;  %s865_s5 = inlined_call_operand.hbm [shape: f32[2,128], index: 5, kind: output, shape index: {}]  }
   0x1   :  { %v561_v0 = vld [vmem:[%s861_s1 + $0x4] ss:$8 sps:$4 sm:$0xff]   ;;  %v563_v1 = vld [vmem:[%s861_s1] ss:$8 sps:$4 sm:$0xff]   ;;  %v564_v2 = vld [vmem:[%s861_s1 + $0x14] ss:$8 sps:$4 sm:$0xff]   ;;  %v77_v11 = vunpack.c.l.s4 %v649_v10 }
   0x2   :  { %252 = vmatprep.subr.bf16.mxu0 %v561_v0  ;;  %v566_v3 = vld [vmem:[%s861_s1 + $0x10] ss:$8 sps:$4 sm:$0xff]   ;;  %v567_v4 = vld [vmem:[%s861_s1 + $0x24] ss:$8 sps:$4 sm:$0xff]   ;;  %v569_v5 = vld [vmem:[%s861_s1 + $0x20] ss:$8 sps:$4 sm:$0xff]  }
   0x3   :  { %253 = vmatpush1.bf16.msra.mxu0 %v563_v1  ;;  %v570_v6 = vld [vmem:[%s861_s1 + $0x34] ss:$8 sps:$4 sm:$0xff]   ;;  %v572_v7 = vld [vmem:[%s861_s1 + $0x30] ss:$8 sps:$4 sm:$0xff]   ;;  %v573_v8 = vld [vmem:[%s861_s1 + $0x44] ss:$8 sps:$4 sm:$0xff]   ;;  %v78_v15 = vunpack.c.0.s8 %v77_v11 }
   0x4   :  { %254 = vmatprep.subr.bf16.mxu0 %v564_v2  ;;  %v575_v12 = vld [vmem:[%s861_s1 + $0x40] ss:$8 sps:$4 sm:$0xff]   ;;  %v576_v13 = vld [vmem:[%s861_s1 + $0x54] ss:$8 sps:$4 sm:$0xff]   ;;  %v714_v14 = vshrl.u32 %v57_v9, 7 }
   0x5   :  { %v578_v16 = vld [vmem:[%s861_s1 + $0x50] ss:$8 sps:$4 sm:$0xff]   ;;  %v579_v17 = vld [vmem:[%s861_s1 + $0x64] ss:$8 sps:$4 sm:$0xff]   ;;  %v581_v19 = vld [vmem:[%s861_s1 + $0x60] ss:$8 sps:$4 sm:$0xff]  }
   0x6   :  { %v723_v18 = vsub.s32 %v78_v15, %v714_v14  ;;  %v731_v20 = vld.sshfl [vmem:[%s860_s0] sm:$0x11 pattern:$0x75316420]  ;;  %v582_v21 = vld [vmem:[%s861_s1 + $0x74] ss:$8 sps:$4 sm:$0xff]  }
   0x7   :  { %255 = vmatpush1.bf16.msra.mxu0 %v566_v3  ;;  %v75_v22 = vcombine.high %v731_v20, %v731_v20  ;;  %v609_v23 = vld [vmem:[%s863_s3 + $0x40] sm:$0xff]   ;;  %v611_v26 = vld [vmem:[%s863_s3 + $0x48] sm:$0xff]   ;;  %v613_v28 = vld [vmem:[%s863_s3 + $0x50] sm:$0xff]  }
   0x8   :  { %256 = vmatprep.subr.bf16.mxu0 %v567_v4  ;;  %v610_v24 = vld [vmem:[%s863_s3] sm:$0xff]   ;;  %537 = vmatprep.subr.bf16.mxu1 %v609_v23  ;;  %v612_v27 = vld [vmem:[%s863_s3 + $0x8] sm:$0xff]   ;;  %v584_v29 = vld [vmem:[%s861_s1 + $0x70] ss:$8 sps:$4 sm:$0xff]  }
   0x9   :  { %v89_v25 = vrot.slane %v75_v22, %v723_v18  ;;  %538 = vmatpush3.bf16.msra.mxu1 %v610_v24  ;;  %v585_v30 = vld [vmem:[%s861_s1 + $0x84] ss:$8 sps:$4 sm:$0xff]   ;;  %v614_v31 = vld [vmem:[%s863_s3 + $0x10] sm:$0xff]   ;;  %v615_v32 = vld [vmem:[%s863_s3 + $0x58] sm:$0xff]  }
   0xa   :  { %539 = vmatprep.subr.bf16.mxu1 %v611_v26  ;;  %v587_v33 = vld [vmem:[%s861_s1 + $0x80] ss:$8 sps:$4 sm:$0xff]   ;;  %v588_v34 = vld [vmem:[%s861_s1 + $0x94] ss:$8 sps:$4 sm:$0xff]   ;;  %v590_v35 = vld [vmem:[%s861_s1 + $0x90] ss:$8 sps:$4 sm:$0xff]  }
   0xb   :  { %257 = vmatpush1.bf16.msra.mxu0 %v569_v5  ;;  %284 = vmatprep.mubr.bf16.mxu0 %v89_v25  ;;  %v616_v36 = vld [vmem:[%s863_s3 + $0x18] sm:$0xff]   ;;  %v591_v37 = vld [vmem:[%s861_s1 + $0xa4] ss:$8 sps:$4 sm:$0xff]  }
   0xc   :  { %258 = vmatprep.subr.bf16.mxu0 %v570_v6  ;;  %v617_v38 = vld [vmem:[%s863_s3 + $0x60] sm:$0xff]  }
   0xd   :  { %540 = vmatpush3.bf16.msra.mxu1 %v612_v27  ;;  %v618_v39 = vld [vmem:[%s863_s3 + $0x20] sm:$0xff]  }
   0xe   :  { %541 = vmatprep.subr.bf16.mxu1 %v613_v28 }
   0xf   :  { %259 = vmatpush1.bf16.msra.mxu0 %v572_v7 }
  0x10   :  { %260 = vmatprep.subr.bf16.mxu0 %v573_v8 }
  0x11   :  { %542 = vmatpush3.bf16.msra.mxu1 %v614_v31 }
  0x12   :  { %543 = vmatprep.subr.bf16.mxu1 %v615_v32 }
  0x13   :  { %261 = vmatpush1.bf16.msra.mxu0 %v575_v12 }
  0x14   :  { %262 = vmatprep.subr.bf16.mxu0 %v576_v13 }
  0x15   :  { %544 = vmatpush3.bf16.msra.mxu1 %v616_v36 }
  0x17   :  { %263 = vmatpush1.bf16.msra.mxu0 %v578_v16 }
  0x18   :  { %264 = vmatprep.subr.bf16.mxu0 %v579_v17 }
  0x1b   :  { %265 = vmatpush1.bf16.msra.mxu0 %v581_v19 }
  0x1c   :  { %266 = vmatprep.subr.bf16.mxu0 %v582_v21 }
  0x1f   :  { %267 = vmatpush1.bf16.msra.mxu0 %v584_v29 }
  0x20   :  { %268 = vmatprep.subr.bf16.mxu0 %v585_v30 }
  0x23   :  { %269 = vmatpush1.bf16.msra.mxu0 %v587_v33 }
  0x24   :  { %270 = vmatprep.subr.bf16.mxu0 %v588_v34 }
  0x25   :  { %10 = vsyncpa [#allocation3], 0  ;;  %545 = vmatprep.subr.bf16.mxu1 %v617_v38  ;;  %v619_v40 = vld [vmem:[%s863_s3 + $0x68] sm:$0xff]   ;;  %v594_v42 = vld [vmem:[%s861_s1 + $0xb4] ss:$8 sps:$4 sm:$0xff]   ;;  %v82_v53 = vrot.slane %v731_v20, %v723_v18  ;;  %v59_v58 = vsub.s32 0, %v714_v14 }
  0x26   :  { %v593_v41 = vld [vmem:[%s861_s1 + $0xa0] ss:$8 sps:$4 sm:$0xff]   ;;  %546 = vmatpush3.bf16.msra.mxu1 %v618_v39  ;;  %v596_v44 = vld [vmem:[%s861_s1 + $0xb0] ss:$8 sps:$4 sm:$0xff]   ;;  %v597_v45 = vld [vmem:[%s861_s1 + $0xc4] ss:$8 sps:$4 sm:$0xff]  }
  0x27   :  { %271 = vmatpush1.bf16.msra.mxu0 %v590_v35  ;;  %v620_v43 = vld [vmem:[%s863_s3 + $0x28] sm:$0xff]   ;;  %547 = vmatprep.subr.bf16.mxu1 %v619_v40  ;;  %v600_v47 = vld [vmem:[%s861_s1 + $0xd4] ss:$8 sps:$4 sm:$0xff]   ;;  %v602_v48 = vld [vmem:[%s861_s1 + $0xd0] ss:$8 sps:$4 sm:$0xff]   ;;  %v63_v60 = vsub.s32 1, %v714_v14 }
  0x28   :  { %272 = vmatprep.subr.bf16.mxu0 %v591_v37  ;;  %v599_v46 = vld [vmem:[%s861_s1 + $0xc0] ss:$8 sps:$4 sm:$0xff]   ;;  %v603_v49 = vld [vmem:[%s861_s1 + $0xe4] ss:$8 sps:$4 sm:$0xff]   ;;  %v606_v51 = vld [vmem:[%s861_s1 + $0xf4] ss:$8 sps:$4 sm:$0xff]  }
  0x29   :  { %v605_v50 = vld [vmem:[%s861_s1 + $0xe0] ss:$8 sps:$4 sm:$0xff]   ;;  %v608_v52 = vld [vmem:[%s861_s1 + $0xf0] ss:$8 sps:$4 sm:$0xff]   ;;  %s650_s14 = smov [#allocation2]  }
  0x2a   :  { %548 = vmatpush3.bf16.msra.mxu1 %v620_v43  ;;  %v621_v54 = vld [vmem:[%s863_s3 + $0x70] sm:$0xff]   ;;  %v623_v56 = vld [vmem:[%s863_s3 + $0x78] sm:$0xff]   ;;  %v55_v59 = vld [vmem:[%s862_s2] sm:$0x3]  ;;  %s479_s15 = sshll.u32 %s650_s14, 4  ;;  %s480_s15 = int_to_ptr.vmem [resolvable:$true] %s479_s15 }
  0x2b   :  { %273 = vmatpush1.bf16.msra.mxu0 %v593_v41  ;;  %v622_v55 = vld [vmem:[%s863_s3 + $0x30] sm:$0xff]   ;;  %549 = vmatprep.subr.bf16.mxu1 %v621_v54  ;;  %v624_v57 = vld [vmem:[%s863_s3 + $0x38] sm:$0xff]   ;;  %v60_v61 = vrot.slane %v55_v59, %v59_v58  ;;  %v64_v62 = vrot.slane %v55_v59, %v63_v60  ;;  %v520_v11 = vld [vmem:[%s864_s4] ss:$0 sm:$0xff]  ;;  %s625_s16 = scalar_lea.vmem %s480_s15, 32  ;;  %p630_p1 = scmp.lt.s32.totalorder %s480_s15, %s480_s15 }
  0x2c   :  { %274 = vmatprep.subr.bf16.mxu0 %v594_v42  ;;  %p626_p0 = scmp.ne.s32.totalorder %s480_s15, %s625_s16  ;;  %p631_p2 = scmp.lt.s32.totalorder %s625_s16, %s625_s16 }
  0x2e   :  { %550 = vmatpush3.bf16.msra.mxu1 %v622_v55  ;;  %p632_p3 = por %p631_p2, %p630_p1 }
  0x2f   :  { %275 = vmatpush1.bf16.msra.mxu0 %v596_v44  ;;  %551 = vmatprep.subr.bf16.mxu1 %v623_v56 }
  0x30   :  { %276 = vmatprep.subr.bf16.mxu0 %v597_v45  ;;  %p633_p4 = pnand %p632_p3, %p626_p0 }
  0x32   :  { %552 = vmatpush3.bf16.msra.mxu1 %v624_v57 }
  0x33   :  { %277 = vmatpush1.bf16.msra.mxu0 %v599_v46 }
  0x34   :  { %278 = vmatprep.subr.bf16.mxu0 %v600_v47 }
  0x37   :  { %279 = vmatpush1.bf16.msra.mxu0 %v602_v48 }
  0x38   :  { %280 = vmatprep.subr.bf16.mxu0 %v603_v49 }
  0x3b   :  { %281 = vmatpush1.bf16.msra.mxu0 %v605_v50 }
  0x3c   :  { %282 = vmatprep.subr.bf16.mxu0 %v606_v51 }
  0x3f   :  { %283 = vmatpush1.bf16.msra.mxu0 %v608_v52 }
  0x42   :  { %285 = vmatmul.mubr.bf16.vlgmr.msra.gmra.mrb[0].mxu0 %v82_v53 }
 0x115   :  { %v286_v63 = vpop.f32.mrb[0].mxu0 }
 0x116   :  { %v287_v0 = vadd.f32 %v286_v63, %v60_v61  ;;  %v288_v1 = vpop.f32.mrb[1].mxu0 }
 0x117   :  { %v289_v2 = vadd.f32 %v288_v1, %v64_v62  ;;  %v290_v3 = vpop.f32.mrb[2].mxu0 }
 0x118   :  { %v293_v4 = vmax.f32 %v287_v0, 0.0  ;;  %v291_v5 = vpop.f32.mrb[3].mxu0 }
 0x119   :  { %v294_v6 = vmax.f32 %v289_v2, 0.0 }
 0x11a   :  { %v295_v8 = vpack.c.bf16 %v293_v4, %v293_v4 }
 0x11b   :  { %v296_v7 = vpack.c.bf16 %v294_v6, %v294_v6 }
 0x11d   :  { %464 = vmatprep.mubr.bf16.mxu1 %v296_v7 }
 0x11e   :  { %465 = vmatmul.mubr.bf16.vlgmr.msra.gmra.mrb[0].mxu1 %v295_v8 }
 0x1f1   :  { %v553_v9 = vpop.f32.mrb[0].mxu1 }
 0x1f2   :  { %v554_v10 = vpop.f32.mrb[1].mxu1 }
 0x1f3   :  { %v555_v12 = vadd.f32 %v554_v10, %v553_v9  ;;  %v556_v13 = vpop.f32.mrb[2].mxu1 }
 0x1f4   :  { %v557_v14 = vpop.f32.mrb[3].mxu1 }
 0x1f5   :  { %v467_v15 = vadd.f32 %v555_v12, %v520_v11 }
 0x1f7   :  { %472 = vst [vmem:[#allocation2] sm:$0x3] %v467_v15 }
 0x1f8   :  { %636 = shalt.err (!%p633_p4)
}
 0x1f9   :  { %s637_s19 = scalar_lea.hbm %s865_s5, 32 }
 0x1fa   :  { %p638_p5 = scmp.ne.s32.totalorder %s865_s5, %s637_s19  ;;  %p641_p6 = scmp.lt.u32.totalorder %s637_s19, %s865_s5 }
 0x1fc   :  { %p643_p7 = pnand %p641_p6, %p638_p5 }
 0x1fe   :  { %646 = shalt.err (!%p643_p7)
}
 0x1ff   :  { %482 = dma.vmem_to_hbm [thread:$0]  %s480_s15, 32, %s865_s5, [#allocation3]  }
 0x200   :  { %647 = dma.done.wait [#allocation3], 32  }
 0x201   :  { %648 = vsyncadd [#allocation3], 4294967264 }
 0x202   :  { %486 = vsyncpa [#allocation3], 1 }

// kernel: conv_model_forward.4
= control target key start
LH: loop header
LB: loop body
LE: loop exit
PB: predicated region body
PF: predicated region fallthrough
CT: control target
= control target key end

     0   :  { %v990_v0 = vmov 0.0   ;;  %vm991_vm0 = vmmov 0   ;;  %vm71_vm1 = vcmask 523264   ;;  %vm365_vm2 = vcmask 257024   ;;  %s1205_s1 = inlined_call_operand.vmem [shape: bf16[4,64,32], index: 1, kind: input, shape index: {}]   ;;  %s1206_s0 = inlined_call_operand.vmem [shape: bf16[2,15,64], index: 0, kind: input, shape index: {}]   ;;  %s1207_s2 = inlined_call_operand.vmem [shape: f32[1,32], index: 2, kind: input, shape index: {}]   ;;  %s1208_s3 = inlined_call_operand.vmem [shape: bf16[2,8,32], index: 3, kind: output, shape index: {}]  }
   0x1   :  { %854 = vmatprep.subr.bf16.mxu0 %v990_v0  ;;  %866 = vmatprep.subr.bf16.mxu1 %v990_v0  ;;  %v952_v1 = vld [vmem:[%s1205_s1 + $0x20] sm:$0xff]   ;;  %v954_v3 = vld [vmem:[%s1205_s1 + $0x28] sm:$0xff]   ;;  %v956_v5 = vld [vmem:[%s1205_s1 + $0x30] sm:$0xff]  }
   0x2   :  { %v953_v2 = vld [vmem:[%s1205_s1] sm:$0xff]   ;;  %862 = vmatprep.mubr.msk.bf16.mxu0 %vm991_vm0, %v990_v0  ;;  %874 = vmatprep.mubr.msk.bf16.mxu1 %vm991_vm0, %v990_v0  ;;  %v955_v4 = vld [vmem:[%s1205_s1 + $0x8] sm:$0xff]   ;;  %v957_v6 = vld [vmem:[%s1205_s1 + $0x10] sm:$0xff]  }
   0x3   :  { %855 = vmatpush3.bf16.msra.mxu0 %v952_v1  ;;  %867 = vmatpush3.bf16.msra.mxu1 %v953_v2  ;;  %v16_v7 = vld [vmem:[%s1206_s0] sm:$0xf]  ;;  %v25_v8 = vld [vmem:[%s1206_s0 + $0x4] sm:$0x1]  ;;  %v958_v10 = vld [vmem:[%s1205_s1 + $0x38] sm:$0xff]  }
   0x4   :  { %856 = vmatprep.subr.bf16.mxu0 %v990_v0  ;;  %868 = vmatprep.subr.bf16.mxu1 %v990_v0  ;;  %v721_v9 = vcombine.low %v16_v7, %v25_v8  ;;  %v959_v11 = vld [vmem:[%s1205_s1 + $0x18] sm:$0xff]   ;;  %v961_v15 = vld [vmem:[%s1205_s1 + $0x40] sm:$0xff]   ;;  %v963_v20 = vld [vmem:[%s1205_s1 + $0x48] sm:$0xff]  }
   0x5   :  { %v962_v17 = vld [vmem:[%s1205_s1 + $0x60] sm:$0xff]   ;;  %v964_v22 = vld [vmem:[%s1205_s1 + $0x68] sm:$0xff]   ;;  %v965_v26 = vld [vmem:[%s1205_s1 + $0x50] sm:$0xff]  }
   0x6   :  { %v41_v12 = vshrl.u32 %v721_v9, 16  ;;  %v43_v13 = vshll.u32 %v721_v9, 16  ;;  %v182_v18 = vld [vmem:[%s1206_s0] sm:$0xe]  ;;  %v183_v19 = vld [vmem:[%s1206_s0 + $0x4] sm:$0x3] }
   0x7   :  { %857 = vmatpush3.bf16.msra.mxu0 %v954_v3  ;;  %869 = vmatpush3.bf16.msra.mxu1 %v955_v4  ;;  %v740_v21 = vcombine.low %v182_v18, %v183_v19  ;;  %v274_v23 = vld [vmem:[%s1206_s0] sm:$0xc]  ;;  %v966_v27 = vld [vmem:[%s1205_s1 + $0x70] sm:$0xff]   ;;  %v967_v31 = vld [vmem:[%s1205_s1 + $0x58] sm:$0xff]  }
   0x8   :  { %858 = vmatprep.subr.bf16.mxu0 %v990_v0  ;;  %870 = vmatprep.subr.bf16.mxu1 %v990_v0  ;;  %v45_v14 = vrot.slane %v43_v13, 1  ;;  %v754_v28 = vcombine.low %v274_v23, %v183_v19  ;;  %v968_v32 = vld [vmem:[%s1205_s1 + $0x78] sm:$0xff]   ;;  %v971_v34 = vld [vmem:[%s1205_s1 + $0x20] sm:$0xff]   ;;  %v761_v36 = vld [vmem:[%s1206_s0 + $0x8] sm:$0xf] }
   0x9   :  { %v199_v24 = vshrl.u32 %v740_v21, 16  ;;  %v202_v25 = vshll.u32 %v740_v21, 16  ;;  %v762_v37 = vld [vmem:[%s1206_s0 + $0xc] sm:$0x1]  ;;  %v972_v38 = vld [vmem:[%s1205_s1] sm:$0xff]   ;;  %v975_v43 = vld [vmem:[%s1205_s1 + $0x30] sm:$0xff]  }
   0xa   :  { %v46_v16 = vor.u32 %v45_v14, %v41_v12  ;;  %v287_v33 = vrot.slane %v754_v28, 2  ;;  %v771_v39 = vcombine.low %v761_v36, %v762_v37  ;;  %v973_v40 = vld [vmem:[%s1205_s1 + $0x28] sm:$0xff]   ;;  %v976_v44 = vld [vmem:[%s1205_s1 + $0x10] sm:$0xff]   ;;  %v977_v47 = vld [vmem:[%s1205_s1 + $0x38] sm:$0xff]  }
   0xb   :  { %859 = vmatpush3.bf16.msra.mxu0 %v956_v5  ;;  %871 = vmatpush3.bf16.msra.mxu1 %v957_v6  ;;  %v201_v29 = vrot.slane %v199_v24, 1  ;;  %v204_v30 = vrot.slane %v202_v25, 2  ;;  %v974_v41 = vld [vmem:[%s1205_s1 + $0x8] sm:$0xff]   ;;  %v978_v48 = vld [vmem:[%s1205_s1 + $0x18] sm:$0xff]   ;;  %v980_v50 = vld [vmem:[%s1205_s1 + $0x40] sm:$0xff]  }
   0xc   :  { %860 = vmatprep.subr.bf16.mxu0 %v990_v0  ;;  %872 = vmatprep.subr.bf16.mxu1 %v990_v0  ;;  %v394_v42 = vshll.u32 %v771_v39, 16  ;;  %v392_v45 = vshrl.u32 %v771_v39, 16  ;;  %v782_v51 = vld [vmem:[%s1206_s0 + $0x8] sm:$0xe]  ;;  %v783_v52 = vld [vmem:[%s1206_s0 + $0xc] sm:$0x3] }
   0xd   :  { %v205_v35 = vor.u32 %v204_v30, %v201_v29  ;;  %v981_v53 = vld [vmem:[%s1205_s1 + $0x60] sm:$0xff]   ;;  %v792_v54 = vcombine.low %v782_v51, %v783_v52  ;;  %v982_v55 = vld [vmem:[%s1205_s1 + $0x48] sm:$0xff]   ;;  %v984_v59 = vld [vmem:[%s1205_s1 + $0x50] sm:$0xff]  }
   0xe   :  { %v396_v46 = vrot.slane %v394_v42, 1  ;;  %v983_v56 = vld [vmem:[%s1205_s1 + $0x68] sm:$0xff]   ;;  %v985_v60 = vld [vmem:[%s1205_s1 + $0x70] sm:$0xff]   ;;  %v986_v1 = vld [vmem:[%s1205_s1 + $0x58] sm:$0xff]  }
   0xf   :  { %861 = vmatpush3.bf16.msra.mxu0 %v958_v10  ;;  %873 = vmatpush3.bf16.msra.mxu1 %v959_v11  ;;  %v548_v57 = vshrl.u32 %v792_v54, 16  ;;  %v551_v58 = vshll.u32 %v792_v54, 16  ;;  %v798_v61 = vld [vmem:[%s1206_s0 + $0x8] sm:$0xc]  ;;  %v987_v3 = vld [vmem:[%s1205_s1 + $0x78] sm:$0xff]  }
  0x10   :  { %878 = vmatprep.subr.bf16.mxu0 %v990_v0  ;;  %890 = vmatprep.subr.bf16.mxu1 %v990_v0  ;;  %v397_v49 = vor.u32 %v396_v46, %v392_v45  ;;  %v807_v2 = vcombine.low %v798_v61, %v783_v52  ;;  %v760_v18 = vld [vmem:[%s1207_s2] ss:$0 sm:$0xff] }
  0x11   :  { %v550_v62 = vrot.slane %v548_v57, 1  ;;  %v553_v63 = vrot.slane %v551_v58, 2 }
  0x12   :  { %863 = vmatmul.mubr.msk.bf16.vlgmr.msra.gmra.mrb[0].mxu0 %vm71_vm1, %v46_v16  ;;  %875 = vmatmul.mubr.msk.bf16.vlgmr.msra.gmra.mrb[0].mxu1 %vm71_vm1, %v16_v7  ;;  %v635_v5 = vrot.slane %v807_v2, 2 }
  0x13   :  { %879 = vmatpush3.bf16.msra.mxu0 %v961_v15  ;;  %891 = vmatpush3.bf16.msra.mxu1 %v962_v17  ;;  %v554_v4 = vor.u32 %v553_v63, %v550_v62 }
  0x14   :  { %880 = vmatprep.subr.bf16.mxu0 %v990_v0  ;;  %892 = vmatprep.subr.bf16.mxu1 %v990_v0 }
  0x15   :  { %886 = vmatprep.mubr.msk.bf16.mxu0 %vm991_vm0, %v990_v0  ;;  %898 = vmatprep.mubr.msk.bf16.mxu1 %vm991_vm0, %v990_v0 }
  0x17   :  { %881 = vmatpush3.bf16.msra.mxu0 %v963_v20  ;;  %893 = vmatpush3.bf16.msra.mxu1 %v964_v22 }
  0x18   :  { %882 = vmatprep.subr.bf16.mxu0 %v990_v0  ;;  %894 = vmatprep.subr.bf16.mxu1 %v990_v0 }
  0x1b   :  { %883 = vmatpush3.bf16.msra.mxu0 %v965_v26  ;;  %895 = vmatpush3.bf16.msra.mxu1 %v966_v27 }
  0x1c   :  { %884 = vmatprep.subr.bf16.mxu0 %v990_v0  ;;  %896 = vmatprep.subr.bf16.mxu1 %v990_v0 }
  0x1f   :  { %885 = vmatpush3.bf16.msra.mxu0 %v967_v31  ;;  %897 = vmatpush3.bf16.msra.mxu1 %v968_v32 }
  0x20   :  { %902 = vmatprep.subr.bf16.mxu0 %v990_v0  ;;  %914 = vmatprep.subr.bf16.mxu1 %v990_v0 }
  0x22   :  { %887 = vmatmul.mubr.msk.bf16.vlgmr.msra.gmra.mrb[4].mxu0 %vm71_vm1, %v205_v35  ;;  %899 = vmatmul.mubr.msk.bf16.vlgmr.msra.gmra.mrb[4].mxu1 %vm71_vm1, %v287_v33 }
  0x23   :  { %903 = vmatpush3.bf16.msra.mxu0 %v971_v34  ;;  %915 = vmatpush3.bf16.msra.mxu1 %v972_v38 }
  0x24   :  { %904 = vmatprep.subr.bf16.mxu0 %v990_v0  ;;  %916 = vmatprep.subr.bf16.mxu1 %v990_v0 }
  0x25   :  { %910 = vmatprep.mubr.msk.bf16.mxu0 %vm991_vm0, %v990_v0  ;;  %922 = vmatprep.mubr.msk.bf16.mxu1 %vm991_vm0, %v990_v0 }
  0x27   :  { %905 = vmatpush3.bf16.msra.mxu0 %v973_v40  ;;  %917 = vmatpush3.bf16.msra.mxu1 %v974_v41 }
  0x28   :  { %906 = vmatprep.subr.bf16.mxu0 %v990_v0  ;;  %918 = vmatprep.subr.bf16.mxu1 %v990_v0 }
  0x2b   :  { %907 = vmatpush3.bf16.msra.mxu0 %v975_v43  ;;  %919 = vmatpush3.bf16.msra.mxu1 %v976_v44 }
  0x2c   :  { %908 = vmatprep.subr.bf16.mxu0 %v990_v0  ;;  %920 = vmatprep.subr.bf16.mxu1 %v990_v0 }
  0x2f   :  { %909 = vmatpush3.bf16.msra.mxu0 %v977_v47  ;;  %921 = vmatpush3.bf16.msra.mxu1 %v978_v48 }
  0x30   :  { %926 = vmatprep.subr.bf16.mxu0 %v990_v0  ;;  %938 = vmatprep.subr.bf16.mxu1 %v990_v0 }
  0x32   :  { %911 = vmatmul.mubr.msk.bf16.vlgmr.msra.gmra.mrb[8].mxu0 %vm71_vm1, %v397_v49  ;;  %923 = vmatmul.mubr.msk.bf16.vlgmr.msra.gmra.mrb[8].mxu1 %vm71_vm1, %v761_v36 }
  0x33   :  { %927 = vmatpush3.bf16.msra.mxu0 %v980_v50  ;;  %939 = vmatpush3.bf16.msra.mxu1 %v981_v53 }
  0x34   :  { %928 = vmatprep.subr.bf16.mxu0 %v990_v0  ;;  %940 = vmatprep.subr.bf16.mxu1 %v990_v0 }
  0x35   :  { %934 = vmatprep.mubr.msk.bf16.mxu0 %vm991_vm0, %v990_v0  ;;  %946 = vmatprep.mubr.msk.bf16.mxu1 %vm991_vm0, %v990_v0 }
  0x37   :  { %929 = vmatpush3.bf16.msra.mxu0 %v982_v55  ;;  %941 = vmatpush3.bf16.msra.mxu1 %v983_v56 }
  0x38   :  { %930 = vmatprep.subr.bf16.mxu0 %v990_v0  ;;  %942 = vmatprep.subr.bf16.mxu1 %v990_v0 }
  0x3b   :  { %931 = vmatpush3.bf16.msra.mxu0 %v984_v59  ;;  %943 = vmatpush3.bf16.msra.mxu1 %v985_v60 }
  0x3c   :  { %932 = vmatprep.subr.bf16.mxu0 %v990_v0  ;;  %944 = vmatprep.subr.bf16.mxu1 %v990_v0 }
  0x3f   :  { %933 = vmatpush3.bf16.msra.mxu0 %v986_v1  ;;  %945 = vmatpush3.bf16.msra.mxu1 %v987_v3 }
  0x42   :  { %935 = vmatmul.mubr.msk.bf16.vlgmr.msra.gmra.mrb[12].mxu0 %vm71_vm1, %v554_v4  ;;  %947 = vmatmul.mubr.msk.bf16.vlgmr.msra.gmra.mrb[12].mxu1 %vm71_vm1, %v635_v5 }
  0xe5   :  { %v109_v6 = vpop.f32.mrb[0].mxu0  ;;  %v176_v7 = vpop.f32.mrb[0].mxu1 }
  0xe6   :  { %v864_v8 = vpop.f32.mrb[1].mxu0  ;;  %v177_v9 = vadd.f32 %v176_v7, %v109_v6  ;;  %v876_v10 = vpop.f32.mrb[1].mxu1 }
  0xe7   :  { %v112_v11 = vpop.f32.mrb[2].mxu0  ;;  %v179_v12 = vpop.f32.mrb[2].mxu1 }
  0xe8   :  { %v865_v13 = vpop.f32.mrb[3].mxu0  ;;  %v877_v14 = vpop.f32.mrb[3].mxu1 }
  0xf5   :  { %v267_v15 = vpop.f32.mrb[4].mxu0  ;;  %v349_v0 = vpop.f32.mrb[4].mxu1 }
  0xf6   :  { %v273_v16 = vadd.f32 %v267_v15, %v177_v9  ;;  %v888_v17 = vpop.f32.mrb[5].mxu0  ;;  %v900_v19 = vpop.f32.mrb[5].mxu1 }
  0xf7   :  { %v270_v20 = vpop.f32.mrb[6].mxu0  ;;  %v352_v22 = vpop.f32.mrb[6].mxu1 }
  0xf8   :  { %v355_v21 = vadd.f32 %v349_v0, %v273_v16  ;;  %v889_v23 = vpop.f32.mrb[7].mxu0  ;;  %v901_v24 = vpop.f32.mrb[7].mxu1 }
  0xfa   :  { %v362_v25 = vadd.f32 %v760_v18, %v355_v21 }
  0xfc   :  { %v363_v26 = vmax.f32 %v362_v25, 0.0 }
  0xfe   :  { %v364_v27 = vpack.c.bf16 %v363_v26, %v363_v26 }
 0x100   :  { %366 = vst.msk [vmem:[%s1208_s3] sm:$0xf] %vm365_vm2, %v364_v27 }
 0x105   :  { %v459_v28 = vpop.f32.mrb[8].mxu0  ;;  %v526_v29 = vpop.f32.mrb[8].mxu1 }
 0x106   :  { %v912_v30 = vpop.f32.mrb[9].mxu0  ;;  %v527_v31 = vadd.f32 %v526_v29, %v459_v28  ;;  %v924_v32 = vpop.f32.mrb[9].mxu1 }
 0x107   :  { %v462_v33 = vpop.f32.mrb[10].mxu0  ;;  %v529_v34 = vpop.f32.mrb[10].mxu1 }
 0x108   :  { %v913_v35 = vpop.f32.mrb[11].mxu0  ;;  %v925_v36 = vpop.f32.mrb[11].mxu1 }
 0x115   :  { %v616_v37 = vpop.f32.mrb[12].mxu0  ;;  %v697_v39 = vpop.f32.mrb[12].mxu1 }
 0x116   :  { %v622_v38 = vadd.f32 %v616_v37, %v527_v31  ;;  %v936_v40 = vpop.f32.mrb[13].mxu0  ;;  %v948_v41 = vpop.f32.mrb[13].mxu1 }
 0x117   :  { %v619_v42 = vpop.f32.mrb[14].mxu0  ;;  %v700_v44 = vpop.f32.mrb[14].mxu1 }
 0x118   :  { %v703_v43 = vadd.f32 %v697_v39, %v622_v38  ;;  %v937_v45 = vpop.f32.mrb[15].mxu0  ;;  %v949_v46 = vpop.f32.mrb[15].mxu1 }
 0x11a   :  { %v704_v47 = vadd.f32 %v760_v18, %v703_v43 }
 0x11c   :  { %v705_v48 = vmax.f32 %v704_v47, 0.0 }
 0x11e   :  { %v706_v49 = vpack.c.bf16 %v705_v48, %v705_v48 }
 0x120   :  { %813 = vst.msk [vmem:[%s1208_s3 + $0x4] sm:$0xf] %vm365_vm2, %v706_v49 }

</bundles_post_ra>
